<compile_context>
chip_gen: v5e
topology: v5e:2x2
jax: 0.10.0
libtpu: 0.0.40
codegen_flags: <defaults>
</compile_context>

<pallas_src>
import functools
import math

import jax
import jax.numpy as jnp
from jax.experimental import pallas as pl
from jax.experimental.pallas import tpu as pltpu


def _sigmoid(z):
    # logistic(z) == 0.5*tanh(0.5*z) + 0.5 : single EUP op, numerically safe.
    return 0.5 * jnp.tanh(0.5 * z) + 0.5


def lstm_kernel(x_ref, wih_ref, whh_ref, b_ref, o_ref, zx_ref, *, n_his, bp):
    # x_ref  : (n_his*Bp, Hp)    inputs, time-major, batch/lane padded
    # wih_ref: (Hp, 4*Hp)        W_ih^T, gate-blocked [i|f|g|o]
    # whh_ref: (Hp, 4*Hp)        W_hh^T, gate-blocked [i|f|g|o]
    # b_ref  : (1, 4*Hp)         b_ih + b_hh, gate-blocked
    # o_ref  : (n_his*Bp, Hp)    relu(x_t + h_t)
    # zx_ref : (n_his*Bp, 4*Hp)  scratch: hoisted input projection (+ bias)
    hp = x_ref.shape[-1]

    # ---- hoisted, non-recurrent: one big matmul for ALL timesteps --------
    zx_ref[...] = (
        jnp.dot(x_ref[...], wih_ref[...], preferred_element_type=jnp.float32)
        + b_ref[...])

    # ---- serial recurrence: only h @ W_hh^T + gate math on critical path --
    def step(t, carry):
        h, c = carry
        r = pl.multiple_of(t * bp, bp)
        z = zx_ref[pl.ds(r, bp), :] + jnp.dot(
            h, whh_ref[...], preferred_element_type=jnp.float32)
        i = _sigmoid(z[:, 0 * hp:1 * hp])
        f = _sigmoid(z[:, 1 * hp:2 * hp])
        g = jnp.tanh(z[:, 2 * hp:3 * hp])
        o = _sigmoid(z[:, 3 * hp:4 * hp])
        c = f * c + i * g
        h = o * jnp.tanh(c)
        # Fused residual + relu (reshape-invariant, see header comment).
        o_ref[pl.ds(r, bp), :] = jnp.maximum(
            x_ref[pl.ds(r, bp), :] + h, 0.0).astype(o_ref.dtype)
        return h, c

    h0 = jnp.zeros((bp, hp), jnp.float32)
    c0 = jnp.zeros((bp, hp), jnp.float32)
    jax.lax.fori_loop(0, n_his, step, (h0, c0), unroll=True)


def pack_lstm_params(w_ih, w_hh, b_ih, b_hh):
    """One-time parameter prep (outside the per-forward path).

    PyTorch nn.LSTM layout: w_ih/w_hh: (4V, V), rows gate-blocked [i; f; g; o];
    b_ih/b_hh: (4V,). Returns W_ih^T / W_hh^T zero-padded to (Hp, 4*Hp) with a
    128-lane block per gate, and combined bias (1, 4*Hp).
    """
    four_v, v = w_ih.shape
    assert four_v == 4 * v
    hp = max(128, ((v + 127) // 128) * 128)

    wih_p = jnp.zeros((hp, 4 * hp), jnp.float32)
    whh_p = jnp.zeros((hp, 4 * hp), jnp.float32)
    b_p = jnp.zeros((1, 4 * hp), jnp.float32)
    b = (b_ih + b_hh).astype(jnp.float32)
    for g in range(4):  # PyTorch gate order: i, f, g, o
        wih_p = wih_p.at[:v, g * hp:g * hp + v].set(
            w_ih[g * v:(g + 1) * v, :].T.astype(jnp.float32))
        whh_p = whh_p.at[:v, g * hp:g * hp + v].set(
            w_hh[g * v:(g + 1) * v, :].T.astype(jnp.float32))
        b_p = b_p.at[0, g * hp:g * hp + v].set(b[g * v:(g + 1) * v])
    return wih_p, whh_p, b_p


@jax.jit
def lstm_layer_forward(x, wih_p, whh_p, b_p):
    """x: (B, 1, n_his, V); wih_p/whh_p/b_p from pack_lstm_params.
       Returns relu(x + LSTM(x.view(n_his,B,V))[0].view_as(x))."""
    B, C, n_his, V = x.shape
    assert C == 1, "channel dim must be 1 (required by the .view in the module)"
    hp = wih_p.shape[0]                       # lane-padded hidden/input width
    bp = max(8, ((B + 7) // 8) * 8)           # sublane-padded batch (f32 tile)

    # Per-forward glue: torch .view equivalent + zero-pad to dense tiles.
    x1 = x.reshape(n_his, B, V)
    x_pad = jnp.zeros((n_his, bp, hp), jnp.float32).at[:, :B, :V].set(x1)
    x2d = x_pad.reshape(n_his * bp, hp)

    out2d = pl.pallas_call(
        functools.partial(lstm_kernel, n_his=n_his, bp=bp),
        out_shape=jax.ShapeDtypeStruct((n_his * bp, hp), x.dtype),
        in_specs=[pl.BlockSpec(memory_space=pltpu.MemorySpace.VMEM)] * 4,
        out_specs=pl.BlockSpec(memory_space=pltpu.MemorySpace.VMEM),
        scratch_shapes=[pltpu.VMEM((n_his * bp, 4 * hp), jnp.float32)],
    )(x2d, wih_p, whh_p, b_p)

    # Drop padding; .view(B, 1, n_his, V) in torch is a flat reshape of the
    # contiguous (n_his, B, V) buffer -> identical to jnp.reshape here.
    out = out2d.reshape(n_his, bp, hp)[:, :B, :V].reshape(B, 1, n_his, V)
    return out


def lstm_layer_reference(x, w_ih, w_hh, b_ih, b_hh):
    """Pure-JAX replica of the PyTorch module for correctness checking."""
    B, _, n_his, V = x.shape
    x1 = x.reshape(n_his, B, V)
    h = jnp.zeros((B, V), jnp.float32)
    c = jnp.zeros((B, V), jnp.float32)
    hs = []
    for t in range(n_his):
        z = x1[t] @ w_ih.T + h @ w_hh.T + b_ih + b_hh
        i = jax.nn.sigmoid(z[:, 0 * V:1 * V])
        f = jax.nn.sigmoid(z[:, 1 * V:2 * V])
        g = jnp.tanh(z[:, 2 * V:3 * V])
        o = jax.nn.sigmoid(z[:, 3 * V:4 * V])
        c = f * c + i * g
        h = o * jnp.tanh(c)
        hs.append(h)
    h_all = jnp.stack(hs, axis=0)                 # (n_his, B, V)
    x2 = h_all.reshape(B, 1, n_his, V)
    return jnp.maximum(x + x2, 0.0)


if __name__ == "__main__":
    # Shapes consistent with the module: batch=2, channel=1, n_his=8,
    # n_vertice=16  =>  LSTM(input=16, hidden=16) over 8 timesteps.
    B, C, n_his, n_vertice = 2, 1, 8, 16
    V = n_vertice

    key = jax.random.PRNGKey(0)
    kx, k1, k2, k3, k4 = jax.random.split(key, 5)

    x = jax.random.normal(kx, (B, C, n_his, V), dtype=jnp.float32)

    # torch.nn.LSTM default init: U(-1/sqrt(H), 1/sqrt(H)) for all params.
    bound = 1.0 / math.sqrt(V)
    w_ih = jax.random.uniform(k1, (4 * V, V), jnp.float32, -bound, bound)
    w_hh = jax.random.uniform(k2, (4 * V, V), jnp.float32, -bound, bound)
    b_ih = jax.random.uniform(k3, (4 * V,), jnp.float32, -bound, bound)
    b_hh = jax.random.uniform(k4, (4 * V,), jnp.float32, -bound, bound)

    # One-time parameter packing (outside the per-forward path).
    wih_p, whh_p, b_p = pack_lstm_params(w_ih, w_hh, b_ih, b_hh)

    out = lstm_layer_forward(x, wih_p, whh_p, b_p)
    out = jax.block_until_ready(out)

    ref = lstm_layer_reference(x, w_ih, w_hh, b_ih, b_hh)
    assert out.shape == (B, 1, n_his, V)
    assert jnp.allclose(out, ref, atol=1e-4, rtol=1e-4), float(
        jnp.max(jnp.abs(out - ref)))

    print("KERNEL_OK")
</pallas_src>

<mosaic_0001>
module attributes {stable_mosaic.version = 11 : i64} {
  func.func @lstm_kernel(%arg0: memref<64x128xf32, #tpu.memory_space<vmem>>, %arg1: memref<128x512xf32, #tpu.memory_space<vmem>>, %arg2: memref<128x512xf32, #tpu.memory_space<vmem>>, %arg3: memref<1x512xf32, #tpu.memory_space<vmem>>, %arg4: memref<64x128xf32, #tpu.memory_space<vmem>>, %arg5: memref<64x512xf32, #tpu.memory_space<vmem>>) attributes {dimension_semantics = [], scalar_prefetch = 0 : i64, scratch_operands = 1 : i64, tpu.core_type = #tpu.core_type<tc>} {
    %c0 = arith.constant 0 : index
    %c0_0 = arith.constant 0 : index
    %0 = vector.load %arg0[%c0, %c0_0] : memref<64x128xf32, #tpu.memory_space<vmem>>, vector<64x128xf32>
    %c0_1 = arith.constant 0 : index
    %c0_2 = arith.constant 0 : index
    %1 = vector.load %arg1[%c0_1, %c0_2] : memref<128x512xf32, #tpu.memory_space<vmem>>, vector<128x512xf32>
    %cst = arith.constant dense<0.000000e+00> : vector<64x512xf32>
    %2 = tpu.matmul %0, %1, %cst {dimension_numbers = #tpu.dot_dimension_numbers<[1], [0], [0], [1], [0, 0, 1, 1], [], []>} : vector<64x128xf32>, vector<128x512xf32>, vector<64x512xf32> -> vector<64x512xf32>
    %c0_3 = arith.constant 0 : index
    %c0_4 = arith.constant 0 : index
    %3 = vector.load %arg3[%c0_3, %c0_4] : memref<1x512xf32, #tpu.memory_space<vmem>>, vector<1x512xf32>
    %4 = vector.broadcast %3 : vector<1x512xf32> to vector<64x512xf32>
    %5 = arith.addf %2, %4 : vector<64x512xf32>
    %c0_5 = arith.constant 0 : index
    %c0_6 = arith.constant 0 : index
    %6 = vector.load %arg5[%c0_5, %c0_6] : memref<64x512xf32, #tpu.memory_space<vmem>>, vector<64x512xf32>
    tpu.vector_store %arg5[%c0_5, %c0_6], %5 {strides = array<i32>} : memref<64x512xf32, #tpu.memory_space<vmem>>, vector<64x512xf32>,
    %cst_7 = arith.constant 0.000000e+00 : f32
    %7 = vector.broadcast %cst_7 : f32 to vector<8x128xf32>
    %cst_8 = arith.constant 0.000000e+00 : f32
    %8 = vector.broadcast %cst_8 : f32 to vector<8x128xf32>
    %c0_i32 = arith.constant 0 : i32
    %c8_i32 = arith.constant 8 : i32
    %9 = arith.muli %c0_i32, %c8_i32 : i32
    %10 = tpu.assume_multiple %9, 8 : i32
    %11 = arith.index_cast %10 : i32 to index
    %c0_9 = arith.constant 0 : index
    %12 = vector.load %arg5[%11, %c0_9] : memref<64x512xf32, #tpu.memory_space<vmem>>, vector<8x512xf32>
    %c0_10 = arith.constant 0 : index
    %c0_11 = arith.constant 0 : index
    %13 = vector.load %arg2[%c0_10, %c0_11] : memref<128x512xf32, #tpu.memory_space<vmem>>, vector<128x512xf32>
    %cst_12 = arith.constant dense<0.000000e+00> : vector<8x512xf32>
    %14 = tpu.matmul %7, %13, %cst_12 {dimension_numbers = #tpu.dot_dimension_numbers<[1], [0], [0], [1], [0, 0, 1, 1], [], []>} : vector<8x128xf32>, vector<128x512xf32>, vector<8x512xf32> -> vector<8x512xf32>
    %15 = arith.addf %12, %14 : vector<8x512xf32>
    %16 = vector.extract_strided_slice %15 {offsets = [0, 0], sizes = [8, 128], strides = [1, 1]} : vector<8x512xf32> to vector<8x128xf32>
    %cst_13 = arith.constant 5.000000e-01 : f32
    %17 = vector.broadcast %cst_13 : f32 to vector<8x128xf32>
    %18 = arith.mulf %17, %16 : vector<8x128xf32>
    %19 = math.tanh %18 : vector<8x128xf32>
    %cst_14 = arith.constant 5.000000e-01 : f32
    %20 = vector.broadcast %cst_14 : f32 to vector<8x128xf32>
    %21 = arith.mulf %20, %19 : vector<8x128xf32>
    %cst_15 = arith.constant 5.000000e-01 : f32
    %22 = vector.broadcast %cst_15 : f32 to vector<8x128xf32>
    %23 = arith.addf %21, %22 : vector<8x128xf32>
    %24 = vector.extract_strided_slice %15 {offsets = [0, 128], sizes = [8, 128], strides = [1, 1]} : vector<8x512xf32> to vector<8x128xf32>
    %cst_16 = arith.constant 5.000000e-01 : f32
    %25 = vector.broadcast %cst_16 : f32 to vector<8x128xf32>
    %26 = arith.mulf %25, %24 : vector<8x128xf32>
    %27 = math.tanh %26 : vector<8x128xf32>
    %cst_17 = arith.constant 5.000000e-01 : f32
    %28 = vector.broadcast %cst_17 : f32 to vector<8x128xf32>
    %29 = arith.mulf %28, %27 : vector<8x128xf32>
    %cst_18 = arith.constant 5.000000e-01 : f32
    %30 = vector.broadcast %cst_18 : f32 to vector<8x128xf32>
    %31 = arith.addf %29, %30 : vector<8x128xf32>
    %32 = vector.extract_strided_slice %15 {offsets = [0, 256], sizes = [8, 128], strides = [1, 1]} : vector<8x512xf32> to vector<8x128xf32>
    %33 = math.tanh %32 : vector<8x128xf32>
    %34 = vector.extract_strided_slice %15 {offsets = [0, 384], sizes = [8, 128], strides = [1, 1]} : vector<8x512xf32> to vector<8x128xf32>
    %cst_19 = arith.constant 5.000000e-01 : f32
    %35 = vector.broadcast %cst_19 : f32 to vector<8x128xf32>
    %36 = arith.mulf %35, %34 : vector<8x128xf32>
    %37 = math.tanh %36 : vector<8x128xf32>
    %cst_20 = arith.constant 5.000000e-01 : f32
    %38 = vector.broadcast %cst_20 : f32 to vector<8x128xf32>
    %39 = arith.mulf %38, %37 : vector<8x128xf32>
    %cst_21 = arith.constant 5.000000e-01 : f32
    %40 = vector.broadcast %cst_21 : f32 to vector<8x128xf32>
    %41 = arith.addf %39, %40 : vector<8x128xf32>
    %42 = arith.mulf %31, %8 : vector<8x128xf32>
    %43 = arith.mulf %23, %33 : vector<8x128xf32>
    %44 = arith.addf %42, %43 : vector<8x128xf32>
    %45 = math.tanh %44 : vector<8x128xf32>
    %46 = arith.mulf %41, %45 : vector<8x128xf32>
    %47 = arith.index_cast %10 : i32 to index
    %c0_22 = arith.constant 0 : index
    %48 = vector.load %arg0[%47, %c0_22] : memref<64x128xf32, #tpu.memory_space<vmem>>, vector<8x128xf32>
    %49 = arith.addf %48, %46 : vector<8x128xf32>
    %cst_23 = arith.constant 0.000000e+00 : f32
    %50 = vector.broadcast %cst_23 : f32 to vector<8x128xf32>
    %51 = arith.maximumf %49, %50 : vector<8x128xf32>
    %52 = arith.index_cast %10 : i32 to index
    %c0_24 = arith.constant 0 : index
    %53 = vector.load %arg4[%52, %c0_24] : memref<64x128xf32, #tpu.memory_space<vmem>>, vector<8x128xf32>
    tpu.vector_store %arg4[%52, %c0_24], %51 {strides = array<i32>} : memref<64x128xf32, #tpu.memory_space<vmem>>, vector<8x128xf32>,
    %c1_i32 = arith.constant 1 : i32
    %c8_i32_25 = arith.constant 8 : i32
    %54 = arith.muli %c1_i32, %c8_i32_25 : i32
    %55 = tpu.assume_multiple %54, 8 : i32
    %56 = arith.index_cast %55 : i32 to index
    %c0_26 = arith.constant 0 : index
    %57 = vector.load %arg5[%56, %c0_26] : memref<64x512xf32, #tpu.memory_space<vmem>>, vector<8x512xf32>
    %c0_27 = arith.constant 0 : index
    %c0_28 = arith.constant 0 : index
    %58 = vector.load %arg2[%c0_27, %c0_28] : memref<128x512xf32, #tpu.memory_space<vmem>>, vector<128x512xf32>
    %cst_29 = arith.constant dense<0.000000e+00> : vector<8x512xf32>
    %59 = tpu.matmul %46, %58, %cst_29 {dimension_numbers = #tpu.dot_dimension_numbers<[1], [0], [0], [1], [0, 0, 1, 1], [], []>} : vector<8x128xf32>, vector<128x512xf32>, vector<8x512xf32> -> vector<8x512xf32>
    %60 = arith.addf %57, %59 : vector<8x512xf32>
    %61 = vector.extract_strided_slice %60 {offsets = [0, 0], sizes = [8, 128], strides = [1, 1]} : vector<8x512xf32> to vector<8x128xf32>
    %cst_30 = arith.constant 5.000000e-01 : f32
    %62 = vector.broadcast %cst_30 : f32 to vector<8x128xf32>
    %63 = arith.mulf %62, %61 : vector<8x128xf32>
    %64 = math.tanh %63 : vector<8x128xf32>
    %cst_31 = arith.constant 5.000000e-01 : f32
    %65 = vector.broadcast %cst_31 : f32 to vector<8x128xf32>
    %66 = arith.mulf %65, %64 : vector<8x128xf32>
    %cst_32 = arith.constant 5.000000e-01 : f32
    %67 = vector.broadcast %cst_32 : f32 to vector<8x128xf32>
    %68 = arith.addf %66, %67 : vector<8x128xf32>
    %69 = vector.extract_strided_slice %60 {offsets = [0, 128], sizes = [8, 128], strides = [1, 1]} : vector<8x512xf32> to vector<8x128xf32>
    %cst_33 = arith.constant 5.000000e-01 : f32
    %70 = vector.broadcast %cst_33 : f32 to vector<8x128xf32>
    %71 = arith.mulf %70, %69 : vector<8x128xf32>
    %72 = math.tanh %71 : vector<8x128xf32>
    %cst_34 = arith.constant 5.000000e-01 : f32
    %73 = vector.broadcast %cst_34 : f32 to vector<8x128xf32>
    %74 = arith.mulf %73, %72 : vector<8x128xf32>
    %cst_35 = arith.constant 5.000000e-01 : f32
    %75 = vector.broadcast %cst_35 : f32 to vector<8x128xf32>
    %76 = arith.addf %74, %75 : vector<8x128xf32>
    %77 = vector.extract_strided_slice %60 {offsets = [0, 256], sizes = [8, 128], strides = [1, 1]} : vector<8x512xf32> to vector<8x128xf32>
    %78 = math.tanh %77 : vector<8x128xf32>
    %79 = vector.extract_strided_slice %60 {offsets = [0, 384], sizes = [8, 128], strides = [1, 1]} : vector<8x512xf32> to vector<8x128xf32>
    %cst_36 = arith.constant 5.000000e-01 : f32
    %80 = vector.broadcast %cst_36 : f32 to vector<8x128xf32>
    %81 = arith.mulf %80, %79 : vector<8x128xf32>
    %82 = math.tanh %81 : vector<8x128xf32>
    %cst_37 = arith.constant 5.000000e-01 : f32
    %83 = vector.broadcast %cst_37 : f32 to vector<8x128xf32>
    %84 = arith.mulf %83, %82 : vector<8x128xf32>
    %cst_38 = arith.constant 5.000000e-01 : f32
    %85 = vector.broadcast %cst_38 : f32 to vector<8x128xf32>
    %86 = arith.addf %84, %85 : vector<8x128xf32>
    %87 = arith.mulf %76, %44 : vector<8x128xf32>
    %88 = arith.mulf %68, %78 : vector<8x128xf32>
    %89 = arith.addf %87, %88 : vector<8x128xf32>
    %90 = math.tanh %89 : vector<8x128xf32>
    %91 = arith.mulf %86, %90 : vector<8x128xf32>
    %92 = arith.index_cast %55 : i32 to index
    %c0_39 = arith.constant 0 : index
    %93 = vector.load %arg0[%92, %c0_39] : memref<64x128xf32, #tpu.memory_space<vmem>>, vector<8x128xf32>
    %94 = arith.addf %93, %91 : vector<8x128xf32>
    %cst_40 = arith.constant 0.000000e+00 : f32
    %95 = vector.broadcast %cst_40 : f32 to vector<8x128xf32>
    %96 = arith.maximumf %94, %95 : vector<8x128xf32>
    %97 = arith.index_cast %55 : i32 to index
    %c0_41 = arith.constant 0 : index
    %98 = vector.load %arg4[%97, %c0_41] : memref<64x128xf32, #tpu.memory_space<vmem>>, vector<8x128xf32>
    tpu.vector_store %arg4[%97, %c0_41], %96 {strides = array<i32>} : memref<64x128xf32, #tpu.memory_space<vmem>>, vector<8x128xf32>,
    %c2_i32 = arith.constant 2 : i32
    %c8_i32_42 = arith.constant 8 : i32
    %99 = arith.muli %c2_i32, %c8_i32_42 : i32
    %100 = tpu.assume_multiple %99, 8 : i32
    %101 = arith.index_cast %100 : i32 to index
    %c0_43 = arith.constant 0 : index
    %102 = vector.load %arg5[%101, %c0_43] : memref<64x512xf32, #tpu.memory_space<vmem>>, vector<8x512xf32>
    %c0_44 = arith.constant 0 : index
    %c0_45 = arith.constant 0 : index
    %103 = vector.load %arg2[%c0_44, %c0_45] : memref<128x512xf32, #tpu.memory_space<vmem>>, vector<128x512xf32>
    %cst_46 = arith.constant dense<0.000000e+00> : vector<8x512xf32>
    %104 = tpu.matmul %91, %103, %cst_46 {dimension_numbers = #tpu.dot_dimension_numbers<[1], [0], [0], [1], [0, 0, 1, 1], [], []>} : vector<8x128xf32>, vector<128x512xf32>, vector<8x512xf32> -> vector<8x512xf32>
    %105 = arith.addf %102, %104 : vector<8x512xf32>
    %106 = vector.extract_strided_slice %105 {offsets = [0, 0], sizes = [8, 128], strides = [1, 1]} : vector<8x512xf32> to vector<8x128xf32>
    %cst_47 = arith.constant 5.000000e-01 : f32
    %107 = vector.broadcast %cst_47 : f32 to vector<8x128xf32>
    %108 = arith.mulf %107, %106 : vector<8x128xf32>
    %109 = math.tanh %108 : vector<8x128xf32>
    %cst_48 = arith.constant 5.000000e-01 : f32
    %110 = vector.broadcast %cst_48 : f32 to vector<8x128xf32>
    %111 = arith.mulf %110, %109 : vector<8x128xf32>
    %cst_49 = arith.constant 5.000000e-01 : f32
    %112 = vector.broadcast %cst_49 : f32 to vector<8x128xf32>
    %113 = arith.addf %111, %112 : vector<8x128xf32>
    %114 = vector.extract_strided_slice %105 {offsets = [0, 128], sizes = [8, 128], strides = [1, 1]} : vector<8x512xf32> to vector<8x128xf32>
    %cst_50 = arith.constant 5.000000e-01 : f32
    %115 = vector.broadcast %cst_50 : f32 to vector<8x128xf32>
    %116 = arith.mulf %115, %114 : vector<8x128xf32>
    %117 = math.tanh %116 : vector<8x128xf32>
    %cst_51 = arith.constant 5.000000e-01 : f32
    %118 = vector.broadcast %cst_51 : f32 to vector<8x128xf32>
    %119 = arith.mulf %118, %117 : vector<8x128xf32>
    %cst_52 = arith.constant 5.000000e-01 : f32
    %120 = vector.broadcast %cst_52 : f32 to vector<8x128xf32>
    %121 = arith.addf %119, %120 : vector<8x128xf32>
    %122 = vector.extract_strided_slice %105 {offsets = [0, 256], sizes = [8, 128], strides = [1, 1]} : vector<8x512xf32> to vector<8x128xf32>
    %123 = math.tanh %122 : vector<8x128xf32>
    %124 = vector.extract_strided_slice %105 {offsets = [0, 384], sizes = [8, 128], strides = [1, 1]} : vector<8x512xf32> to vector<8x128xf32>
    %cst_53 = arith.constant 5.000000e-01 : f32
    %125 = vector.broadcast %cst_53 : f32 to vector<8x128xf32>
    %126 = arith.mulf %125, %124 : vector<8x128xf32>
    %127 = math.tanh %126 : vector<8x128xf32>
    %cst_54 = arith.constant 5.000000e-01 : f32
    %128 = vector.broadcast %cst_54 : f32 to vector<8x128xf32>
    %129 = arith.mulf %128, %127 : vector<8x128xf32>
    %cst_55 = arith.constant 5.000000e-01 : f32
    %130 = vector.broadcast %cst_55 : f32 to vector<8x128xf32>
    %131 = arith.addf %129, %130 : vector<8x128xf32>
    %132 = arith.mulf %121, %89 : vector<8x128xf32>
    %133 = arith.mulf %113, %123 : vector<8x128xf32>
    %134 = arith.addf %132, %133 : vector<8x128xf32>
    %135 = math.tanh %134 : vector<8x128xf32>
    %136 = arith.mulf %131, %135 : vector<8x128xf32>
    %137 = arith.index_cast %100 : i32 to index
    %c0_56 = arith.constant 0 : index
    %138 = vector.load %arg0[%137, %c0_56] : memref<64x128xf32, #tpu.memory_space<vmem>>, vector<8x128xf32>
    %139 = arith.addf %138, %136 : vector<8x128xf32>
    %cst_57 = arith.constant 0.000000e+00 : f32
    %140 = vector.broadcast %cst_57 : f32 to vector<8x128xf32>
    %141 = arith.maximumf %139, %140 : vector<8x128xf32>
    %142 = arith.index_cast %100 : i32 to index
    %c0_58 = arith.constant 0 : index
    %143 = vector.load %arg4[%142, %c0_58] : memref<64x128xf32, #tpu.memory_space<vmem>>, vector<8x128xf32>
    tpu.vector_store %arg4[%142, %c0_58], %141 {strides = array<i32>} : memref<64x128xf32, #tpu.memory_space<vmem>>, vector<8x128xf32>,
    %c3_i32 = arith.constant 3 : i32
    %c8_i32_59 = arith.constant 8 : i32
    %144 = arith.muli %c3_i32, %c8_i32_59 : i32
    %145 = tpu.assume_multiple %144, 8 : i32
    %146 = arith.index_cast %145 : i32 to index
    %c0_60 = arith.constant 0 : index
    %147 = vector.load %arg5[%146, %c0_60] : memref<64x512xf32, #tpu.memory_space<vmem>>, vector<8x512xf32>
    %c0_61 = arith.constant 0 : index
    %c0_62 = arith.constant 0 : index
    %148 = vector.load %arg2[%c0_61, %c0_62] : memref<128x512xf32, #tpu.memory_space<vmem>>, vector<128x512xf32>
    %cst_63 = arith.constant dense<0.000000e+00> : vector<8x512xf32>
    %149 = tpu.matmul %136, %148, %cst_63 {dimension_numbers = #tpu.dot_dimension_numbers<[1], [0], [0], [1], [0, 0, 1, 1], [], []>} : vector<8x128xf32>, vector<128x512xf32>, vector<8x512xf32> -> vector<8x512xf32>
    %150 = arith.addf %147, %149 : vector<8x512xf32>
    %151 = vector.extract_strided_slice %150 {offsets = [0, 0], sizes = [8, 128], strides = [1, 1]} : vector<8x512xf32> to vector<8x128xf32>
    %cst_64 = arith.constant 5.000000e-01 : f32
    %152 = vector.broadcast %cst_64 : f32 to vector<8x128xf32>
    %153 = arith.mulf %152, %151 : vector<8x128xf32>
    %154 = math.tanh %153 : vector<8x128xf32>
    %cst_65 = arith.constant 5.000000e-01 : f32
    %155 = vector.broadcast %cst_65 : f32 to vector<8x128xf32>
    %156 = arith.mulf %155, %154 : vector<8x128xf32>
    %cst_66 = arith.constant 5.000000e-01 : f32
    %157 = vector.broadcast %cst_66 : f32 to vector<8x128xf32>
    %158 = arith.addf %156, %157 : vector<8x128xf32>
    %159 = vector.extract_strided_slice %150 {offsets = [0, 128], sizes = [8, 128], strides = [1, 1]} : vector<8x512xf32> to vector<8x128xf32>
    %cst_67 = arith.constant 5.000000e-01 : f32
    %160 = vector.broadcast %cst_67 : f32 to vector<8x128xf32>
    %161 = arith.mulf %160, %159 : vector<8x128xf32>
    %162 = math.tanh %161 : vector<8x128xf32>
    %cst_68 = arith.constant 5.000000e-01 : f32
    %163 = vector.broadcast %cst_68 : f32 to vector<8x128xf32>
    %164 = arith.mulf %163, %162 : vector<8x128xf32>
    %cst_69 = arith.constant 5.000000e-01 : f32
    %165 = vector.broadcast %cst_69 : f32 to vector<8x128xf32>
    %166 = arith.addf %164, %165 : vector<8x128xf32>
    %167 = vector.extract_strided_slice %150 {offsets = [0, 256], sizes = [8, 128], strides = [1, 1]} : vector<8x512xf32> to vector<8x128xf32>
    %168 = math.tanh %167 : vector<8x128xf32>
    %169 = vector.extract_strided_slice %150 {offsets = [0, 384], sizes = [8, 128], strides = [1, 1]} : vector<8x512xf32> to vector<8x128xf32>
    %cst_70 = arith.constant 5.000000e-01 : f32
    %170 = vector.broadcast %cst_70 : f32 to vector<8x128xf32>
    %171 = arith.mulf %170, %169 : vector<8x128xf32>
    %172 = math.tanh %171 : vector<8x128xf32>
    %cst_71 = arith.constant 5.000000e-01 : f32
    %173 = vector.broadcast %cst_71 : f32 to vector<8x128xf32>
    %174 = arith.mulf %173, %172 : vector<8x128xf32>
    %cst_72 = arith.constant 5.000000e-01 : f32
    %175 = vector.broadcast %cst_72 : f32 to vector<8x128xf32>
    %176 = arith.addf %174, %175 : vector<8x128xf32>
    %177 = arith.mulf %166, %134 : vector<8x128xf32>
    %178 = arith.mulf %158, %168 : vector<8x128xf32>
    %179 = arith.addf %177, %178 : vector<8x128xf32>
    %180 = math.tanh %179 : vector<8x128xf32>
    %181 = arith.mulf %176, %180 : vector<8x128xf32>
    %182 = arith.index_cast %145 : i32 to index
    %c0_73 = arith.constant 0 : index
    %183 = vector.load %arg0[%182, %c0_73] : memref<64x128xf32, #tpu.memory_space<vmem>>, vector<8x128xf32>
    %184 = arith.addf %183, %181 : vector<8x128xf32>
    %cst_74 = arith.constant 0.000000e+00 : f32
    %185 = vector.broadcast %cst_74 : f32 to vector<8x128xf32>
    %186 = arith.maximumf %184, %185 : vector<8x128xf32>
    %187 = arith.index_cast %145 : i32 to index
    %c0_75 = arith.constant 0 : index
    %188 = vector.load %arg4[%187, %c0_75] : memref<64x128xf32, #tpu.memory_space<vmem>>, vector<8x128xf32>
    tpu.vector_store %arg4[%187, %c0_75], %186 {strides = array<i32>} : memref<64x128xf32, #tpu.memory_space<vmem>>, vector<8x128xf32>,
    %c4_i32 = arith.constant 4 : i32
    %c8_i32_76 = arith.constant 8 : i32
    %189 = arith.muli %c4_i32, %c8_i32_76 : i32
    %190 = tpu.assume_multiple %189, 8 : i32
    %191 = arith.index_cast %190 : i32 to index
    %c0_77 = arith.constant 0 : index
    %192 = vector.load %arg5[%191, %c0_77] : memref<64x512xf32, #tpu.memory_space<vmem>>, vector<8x512xf32>
    %c0_78 = arith.constant 0 : index
    %c0_79 = arith.constant 0 : index
    %193 = vector.load %arg2[%c0_78, %c0_79] : memref<128x512xf32, #tpu.memory_space<vmem>>, vector<128x512xf32>
    %cst_80 = arith.constant dense<0.000000e+00> : vector<8x512xf32>
    %194 = tpu.matmul %181, %193, %cst_80 {dimension_numbers = #tpu.dot_dimension_numbers<[1], [0], [0], [1], [0, 0, 1, 1], [], []>} : vector<8x128xf32>, vector<128x512xf32>, vector<8x512xf32> -> vector<8x512xf32>
    %195 = arith.addf %192, %194 : vector<8x512xf32>
    %196 = vector.extract_strided_slice %195 {offsets = [0, 0], sizes = [8, 128], strides = [1, 1]} : vector<8x512xf32> to vector<8x128xf32>
    %cst_81 = arith.constant 5.000000e-01 : f32
    %197 = vector.broadcast %cst_81 : f32 to vector<8x128xf32>
    %198 = arith.mulf %197, %196 : vector<8x128xf32>
    %199 = math.tanh %198 : vector<8x128xf32>
    %cst_82 = arith.constant 5.000000e-01 : f32
    %200 = vector.broadcast %cst_82 : f32 to vector<8x128xf32>
    %201 = arith.mulf %200, %199 : vector<8x128xf32>
    %cst_83 = arith.constant 5.000000e-01 : f32
    %202 = vector.broadcast %cst_83 : f32 to vector<8x128xf32>
    %203 = arith.addf %201, %202 : vector<8x128xf32>
    %204 = vector.extract_strided_slice %195 {offsets = [0, 128], sizes = [8, 128], strides = [1, 1]} : vector<8x512xf32> to vector<8x128xf32>
    %cst_84 = arith.constant 5.000000e-01 : f32
    %205 = vector.broadcast %cst_84 : f32 to vector<8x128xf32>
    %206 = arith.mulf %205, %204 : vector<8x128xf32>
    %207 = math.tanh %206 : vector<8x128xf32>
    %cst_85 = arith.constant 5.000000e-01 : f32
    %208 = vector.broadcast %cst_85 : f32 to vector<8x128xf32>
    %209 = arith.mulf %208, %207 : vector<8x128xf32>
    %cst_86 = arith.constant 5.000000e-01 : f32
    %210 = vector.broadcast %cst_86 : f32 to vector<8x128xf32>
    %211 = arith.addf %209, %210 : vector<8x128xf32>
    %212 = vector.extract_strided_slice %195 {offsets = [0, 256], sizes = [8, 128], strides = [1, 1]} : vector<8x512xf32> to vector<8x128xf32>
    %213 = math.tanh %212 : vector<8x128xf32>
    %214 = vector.extract_strided_slice %195 {offsets = [0, 384], sizes = [8, 128], strides = [1, 1]} : vector<8x512xf32> to vector<8x128xf32>
    %cst_87 = arith.constant 5.000000e-01 : f32
    %215 = vector.broadcast %cst_87 : f32 to vector<8x128xf32>
    %216 = arith.mulf %215, %214 : vector<8x128xf32>
    %217 = math.tanh %216 : vector<8x128xf32>
    %cst_88 = arith.constant 5.000000e-01 : f32
    %218 = vector.broadcast %cst_88 : f32 to vector<8x128xf32>
    %219 = arith.mulf %218, %217 : vector<8x128xf32>
    %cst_89 = arith.constant 5.000000e-01 : f32
    %220 = vector.broadcast %cst_89 : f32 to vector<8x128xf32>
    %221 = arith.addf %219, %220 : vector<8x128xf32>
    %222 = arith.mulf %211, %179 : vector<8x128xf32>
    %223 = arith.mulf %203, %213 : vector<8x128xf32>
    %224 = arith.addf %222, %223 : vector<8x128xf32>
    %225 = math.tanh %224 : vector<8x128xf32>
    %226 = arith.mulf %221, %225 : vector<8x128xf32>
    %227 = arith.index_cast %190 : i32 to index
    %c0_90 = arith.constant 0 : index
    %228 = vector.load %arg0[%227, %c0_90] : memref<64x128xf32, #tpu.memory_space<vmem>>, vector<8x128xf32>
    %229 = arith.addf %228, %226 : vector<8x128xf32>
    %cst_91 = arith.constant 0.000000e+00 : f32
    %230 = vector.broadcast %cst_91 : f32 to vector<8x128xf32>
    %231 = arith.maximumf %229, %230 : vector<8x128xf32>
    %232 = arith.index_cast %190 : i32 to index
    %c0_92 = arith.constant 0 : index
    %233 = vector.load %arg4[%232, %c0_92] : memref<64x128xf32, #tpu.memory_space<vmem>>, vector<8x128xf32>
    tpu.vector_store %arg4[%232, %c0_92], %231 {strides = array<i32>} : memref<64x128xf32, #tpu.memory_space<vmem>>, vector<8x128xf32>,
    %c5_i32 = arith.constant 5 : i32
    %c8_i32_93 = arith.constant 8 : i32
    %234 = arith.muli %c5_i32, %c8_i32_93 : i32
    %235 = tpu.assume_multiple %234, 8 : i32
    %236 = arith.index_cast %235 : i32 to index
    %c0_94 = arith.constant 0 : index
    %237 = vector.load %arg5[%236, %c0_94] : memref<64x512xf32, #tpu.memory_space<vmem>>, vector<8x512xf32>
    %c0_95 = arith.constant 0 : index
    %c0_96 = arith.constant 0 : index
    %238 = vector.load %arg2[%c0_95, %c0_96] : memref<128x512xf32, #tpu.memory_space<vmem>>, vector<128x512xf32>
    %cst_97 = arith.constant dense<0.000000e+00> : vector<8x512xf32>
    %239 = tpu.matmul %226, %238, %cst_97 {dimension_numbers = #tpu.dot_dimension_numbers<[1], [0], [0], [1], [0, 0, 1, 1], [], []>} : vector<8x128xf32>, vector<128x512xf32>, vector<8x512xf32> -> vector<8x512xf32>
    %240 = arith.addf %237, %239 : vector<8x512xf32>
    %241 = vector.extract_strided_slice %240 {offsets = [0, 0], sizes = [8, 128], strides = [1, 1]} : vector<8x512xf32> to vector<8x128xf32>
    %cst_98 = arith.constant 5.000000e-01 : f32
    %242 = vector.broadcast %cst_98 : f32 to vector<8x128xf32>
    %243 = arith.mulf %242, %241 : vector<8x128xf32>
    %244 = math.tanh %243 : vector<8x128xf32>
    %cst_99 = arith.constant 5.000000e-01 : f32
    %245 = vector.broadcast %cst_99 : f32 to vector<8x128xf32>
    %246 = arith.mulf %245, %244 : vector<8x128xf32>
    %cst_100 = arith.constant 5.000000e-01 : f32
    %247 = vector.broadcast %cst_100 : f32 to vector<8x128xf32>
    %248 = arith.addf %246, %247 : vector<8x128xf32>
    %249 = vector.extract_strided_slice %240 {offsets = [0, 128], sizes = [8, 128], strides = [1, 1]} : vector<8x512xf32> to vector<8x128xf32>
    %cst_101 = arith.constant 5.000000e-01 : f32
    %250 = vector.broadcast %cst_101 : f32 to vector<8x128xf32>
    %251 = arith.mulf %250, %249 : vector<8x128xf32>
    %252 = math.tanh %251 : vector<8x128xf32>
    %cst_102 = arith.constant 5.000000e-01 : f32
    %253 = vector.broadcast %cst_102 : f32 to vector<8x128xf32>
    %254 = arith.mulf %253, %252 : vector<8x128xf32>
    %cst_103 = arith.constant 5.000000e-01 : f32
    %255 = vector.broadcast %cst_103 : f32 to vector<8x128xf32>
    %256 = arith.addf %254, %255 : vector<8x128xf32>
    %257 = vector.extract_strided_slice %240 {offsets = [0, 256], sizes = [8, 128], strides = [1, 1]} : vector<8x512xf32> to vector<8x128xf32>
    %258 = math.tanh %257 : vector<8x128xf32>
    %259 = vector.extract_strided_slice %240 {offsets = [0, 384], sizes = [8, 128], strides = [1, 1]} : vector<8x512xf32> to vector<8x128xf32>
    %cst_104 = arith.constant 5.000000e-01 : f32
    %260 = vector.broadcast %cst_104 : f32 to vector<8x128xf32>
    %261 = arith.mulf %260, %259 : vector<8x128xf32>
    %262 = math.tanh %261 : vector<8x128xf32>
    %cst_105 = arith.constant 5.000000e-01 : f32
    %263 = vector.broadcast %cst_105 : f32 to vector<8x128xf32>
    %264 = arith.mulf %263, %262 : vector<8x128xf32>
    %cst_106 = arith.constant 5.000000e-01 : f32
    %265 = vector.broadcast %cst_106 : f32 to vector<8x128xf32>
    %266 = arith.addf %264, %265 : vector<8x128xf32>
    %267 = arith.mulf %256, %224 : vector<8x128xf32>
    %268 = arith.mulf %248, %258 : vector<8x128xf32>
    %269 = arith.addf %267, %268 : vector<8x128xf32>
    %270 = math.tanh %269 : vector<8x128xf32>
    %271 = arith.mulf %266, %270 : vector<8x128xf32>
    %272 = arith.index_cast %235 : i32 to index
    %c0_107 = arith.constant 0 : index
    %273 = vector.load %arg0[%272, %c0_107] : memref<64x128xf32, #tpu.memory_space<vmem>>, vector<8x128xf32>
    %274 = arith.addf %273, %271 : vector<8x128xf32>
    %cst_108 = arith.constant 0.000000e+00 : f32
    %275 = vector.broadcast %cst_108 : f32 to vector<8x128xf32>
    %276 = arith.maximumf %274, %275 : vector<8x128xf32>
    %277 = arith.index_cast %235 : i32 to index
    %c0_109 = arith.constant 0 : index
    %278 = vector.load %arg4[%277, %c0_109] : memref<64x128xf32, #tpu.memory_space<vmem>>, vector<8x128xf32>
    tpu.vector_store %arg4[%277, %c0_109], %276 {strides = array<i32>} : memref<64x128xf32, #tpu.memory_space<vmem>>, vector<8x128xf32>,
    %c6_i32 = arith.constant 6 : i32
    %c8_i32_110 = arith.constant 8 : i32
    %279 = arith.muli %c6_i32, %c8_i32_110 : i32
    %280 = tpu.assume_multiple %279, 8 : i32
    %281 = arith.index_cast %280 : i32 to index
    %c0_111 = arith.constant 0 : index
    %282 = vector.load %arg5[%281, %c0_111] : memref<64x512xf32, #tpu.memory_space<vmem>>, vector<8x512xf32>
    %c0_112 = arith.constant 0 : index
    %c0_113 = arith.constant 0 : index
    %283 = vector.load %arg2[%c0_112, %c0_113] : memref<128x512xf32, #tpu.memory_space<vmem>>, vector<128x512xf32>
    %cst_114 = arith.constant dense<0.000000e+00> : vector<8x512xf32>
    %284 = tpu.matmul %271, %283, %cst_114 {dimension_numbers = #tpu.dot_dimension_numbers<[1], [0], [0], [1], [0, 0, 1, 1], [], []>} : vector<8x128xf32>, vector<128x512xf32>, vector<8x512xf32> -> vector<8x512xf32>
    %285 = arith.addf %282, %284 : vector<8x512xf32>
    %286 = vector.extract_strided_slice %285 {offsets = [0, 0], sizes = [8, 128], strides = [1, 1]} : vector<8x512xf32> to vector<8x128xf32>
    %cst_115 = arith.constant 5.000000e-01 : f32
    %287 = vector.broadcast %cst_115 : f32 to vector<8x128xf32>
    %288 = arith.mulf %287, %286 : vector<8x128xf32>
    %289 = math.tanh %288 : vector<8x128xf32>
    %cst_116 = arith.constant 5.000000e-01 : f32
    %290 = vector.broadcast %cst_116 : f32 to vector<8x128xf32>
    %291 = arith.mulf %290, %289 : vector<8x128xf32>
    %cst_117 = arith.constant 5.000000e-01 : f32
    %292 = vector.broadcast %cst_117 : f32 to vector<8x128xf32>
    %293 = arith.addf %291, %292 : vector<8x128xf32>
    %294 = vector.extract_strided_slice %285 {offsets = [0, 128], sizes = [8, 128], strides = [1, 1]} : vector<8x512xf32> to vector<8x128xf32>
    %cst_118 = arith.constant 5.000000e-01 : f32
    %295 = vector.broadcast %cst_118 : f32 to vector<8x128xf32>
    %296 = arith.mulf %295, %294 : vector<8x128xf32>
    %297 = math.tanh %296 : vector<8x128xf32>
    %cst_119 = arith.constant 5.000000e-01 : f32
    %298 = vector.broadcast %cst_119 : f32 to vector<8x128xf32>
    %299 = arith.mulf %298, %297 : vector<8x128xf32>
    %cst_120 = arith.constant 5.000000e-01 : f32
    %300 = vector.broadcast %cst_120 : f32 to vector<8x128xf32>
    %301 = arith.addf %299, %300 : vector<8x128xf32>
    %302 = vector.extract_strided_slice %285 {offsets = [0, 256], sizes = [8, 128], strides = [1, 1]} : vector<8x512xf32> to vector<8x128xf32>
    %303 = math.tanh %302 : vector<8x128xf32>
    %304 = vector.extract_strided_slice %285 {offsets = [0, 384], sizes = [8, 128], strides = [1, 1]} : vector<8x512xf32> to vector<8x128xf32>
    %cst_121 = arith.constant 5.000000e-01 : f32
    %305 = vector.broadcast %cst_121 : f32 to vector<8x128xf32>
    %306 = arith.mulf %305, %304 : vector<8x128xf32>
    %307 = math.tanh %306 : vector<8x128xf32>
    %cst_122 = arith.constant 5.000000e-01 : f32
    %308 = vector.broadcast %cst_122 : f32 to vector<8x128xf32>
    %309 = arith.mulf %308, %307 : vector<8x128xf32>
    %cst_123 = arith.constant 5.000000e-01 : f32
    %310 = vector.broadcast %cst_123 : f32 to vector<8x128xf32>
    %311 = arith.addf %309, %310 : vector<8x128xf32>
    %312 = arith.mulf %301, %269 : vector<8x128xf32>
    %313 = arith.mulf %293, %303 : vector<8x128xf32>
    %314 = arith.addf %312, %313 : vector<8x128xf32>
    %315 = math.tanh %314 : vector<8x128xf32>
    %316 = arith.mulf %311, %315 : vector<8x128xf32>
    %317 = arith.index_cast %280 : i32 to index
    %c0_124 = arith.constant 0 : index
    %318 = vector.load %arg0[%317, %c0_124] : memref<64x128xf32, #tpu.memory_space<vmem>>, vector<8x128xf32>
    %319 = arith.addf %318, %316 : vector<8x128xf32>
    %cst_125 = arith.constant 0.000000e+00 : f32
    %320 = vector.broadcast %cst_125 : f32 to vector<8x128xf32>
    %321 = arith.maximumf %319, %320 : vector<8x128xf32>
    %322 = arith.index_cast %280 : i32 to index
    %c0_126 = arith.constant 0 : index
    %323 = vector.load %arg4[%322, %c0_126] : memref<64x128xf32, #tpu.memory_space<vmem>>, vector<8x128xf32>
    tpu.vector_store %arg4[%322, %c0_126], %321 {strides = array<i32>} : memref<64x128xf32, #tpu.memory_space<vmem>>, vector<8x128xf32>,
    %c7_i32 = arith.constant 7 : i32
    %c8_i32_127 = arith.constant 8 : i32
    %324 = arith.muli %c7_i32, %c8_i32_127 : i32
    %325 = tpu.assume_multiple %324, 8 : i32
    %326 = arith.index_cast %325 : i32 to index
    %c0_128 = arith.constant 0 : index
    %327 = vector.load %arg5[%326, %c0_128] : memref<64x512xf32, #tpu.memory_space<vmem>>, vector<8x512xf32>
    %c0_129 = arith.constant 0 : index
    %c0_130 = arith.constant 0 : index
    %328 = vector.load %arg2[%c0_129, %c0_130] : memref<128x512xf32, #tpu.memory_space<vmem>>, vector<128x512xf32>
    %cst_131 = arith.constant dense<0.000000e+00> : vector<8x512xf32>
    %329 = tpu.matmul %316, %328, %cst_131 {dimension_numbers = #tpu.dot_dimension_numbers<[1], [0], [0], [1], [0, 0, 1, 1], [], []>} : vector<8x128xf32>, vector<128x512xf32>, vector<8x512xf32> -> vector<8x512xf32>
    %330 = arith.addf %327, %329 : vector<8x512xf32>
    %331 = vector.extract_strided_slice %330 {offsets = [0, 0], sizes = [8, 128], strides = [1, 1]} : vector<8x512xf32> to vector<8x128xf32>
    %cst_132 = arith.constant 5.000000e-01 : f32
    %332 = vector.broadcast %cst_132 : f32 to vector<8x128xf32>
    %333 = arith.mulf %332, %331 : vector<8x128xf32>
    %334 = math.tanh %333 : vector<8x128xf32>
    %cst_133 = arith.constant 5.000000e-01 : f32
    %335 = vector.broadcast %cst_133 : f32 to vector<8x128xf32>
    %336 = arith.mulf %335, %334 : vector<8x128xf32>
    %cst_134 = arith.constant 5.000000e-01 : f32
    %337 = vector.broadcast %cst_134 : f32 to vector<8x128xf32>
    %338 = arith.addf %336, %337 : vector<8x128xf32>
    %339 = vector.extract_strided_slice %330 {offsets = [0, 128], sizes = [8, 128], strides = [1, 1]} : vector<8x512xf32> to vector<8x128xf32>
    %cst_135 = arith.constant 5.000000e-01 : f32
    %340 = vector.broadcast %cst_135 : f32 to vector<8x128xf32>
    %341 = arith.mulf %340, %339 : vector<8x128xf32>
    %342 = math.tanh %341 : vector<8x128xf32>
    %cst_136 = arith.constant 5.000000e-01 : f32
    %343 = vector.broadcast %cst_136 : f32 to vector<8x128xf32>
    %344 = arith.mulf %343, %342 : vector<8x128xf32>
    %cst_137 = arith.constant 5.000000e-01 : f32
    %345 = vector.broadcast %cst_137 : f32 to vector<8x128xf32>
    %346 = arith.addf %344, %345 : vector<8x128xf32>
    %347 = vector.extract_strided_slice %330 {offsets = [0, 256], sizes = [8, 128], strides = [1, 1]} : vector<8x512xf32> to vector<8x128xf32>
    %348 = math.tanh %347 : vector<8x128xf32>
    %349 = vector.extract_strided_slice %330 {offsets = [0, 384], sizes = [8, 128], strides = [1, 1]} : vector<8x512xf32> to vector<8x128xf32>
    %cst_138 = arith.constant 5.000000e-01 : f32
    %350 = vector.broadcast %cst_138 : f32 to vector<8x128xf32>
    %351 = arith.mulf %350, %349 : vector<8x128xf32>
    %352 = math.tanh %351 : vector<8x128xf32>
    %cst_139 = arith.constant 5.000000e-01 : f32
    %353 = vector.broadcast %cst_139 : f32 to vector<8x128xf32>
    %354 = arith.mulf %353, %352 : vector<8x128xf32>
    %cst_140 = arith.constant 5.000000e-01 : f32
    %355 = vector.broadcast %cst_140 : f32 to vector<8x128xf32>
    %356 = arith.addf %354, %355 : vector<8x128xf32>
    %357 = arith.mulf %346, %314 : vector<8x128xf32>
    %358 = arith.mulf %338, %348 : vector<8x128xf32>
    %359 = arith.addf %357, %358 : vector<8x128xf32>
    %360 = math.tanh %359 : vector<8x128xf32>
    %361 = arith.mulf %356, %360 : vector<8x128xf32>
    %362 = arith.index_cast %325 : i32 to index
    %c0_141 = arith.constant 0 : index
    %363 = vector.load %arg0[%362, %c0_141] : memref<64x128xf32, #tpu.memory_space<vmem>>, vector<8x128xf32>
    %364 = arith.addf %363, %361 : vector<8x128xf32>
    %cst_142 = arith.constant 0.000000e+00 : f32
    %365 = vector.broadcast %cst_142 : f32 to vector<8x128xf32>
    %366 = arith.maximumf %364, %365 : vector<8x128xf32>
    %367 = arith.index_cast %325 : i32 to index
    %c0_143 = arith.constant 0 : index
    %368 = vector.load %arg4[%367, %c0_143] : memref<64x128xf32, #tpu.memory_space<vmem>>, vector<8x128xf32>
    tpu.vector_store %arg4[%367, %c0_143], %366 {strides = array<i32>} : memref<64x128xf32, #tpu.memory_space<vmem>>, vector<8x128xf32>,
    %c8_i32_144 = arith.constant 8 : i32
    return
  }
}

</mosaic_0001>

<bundles_post_ra>
// kernel: lstm_layer_forward.1
= control target key start
LH: loop header
LB: loop body
LE: loop exit
PB: predicated region body
PF: predicated region fallthrough
CT: control target
= control target key end

     0   :  { %9 = vsyncpa [#allocation4], 0  ;;  %s2870_s0 = inlined_call_operand.vmem [shape: f32[64,128], index: 0, kind: input, shape index: {}]   ;;  %s2871_s1 = inlined_call_operand.hbm [shape: f32[128,512], index: 1, kind: input, shape index: {}]   ;;  %s2872_s2 = inlined_call_operand.hbm [shape: f32[128,512], index: 2, kind: input, shape index: {}]   ;;  %s2873_s3 = inlined_call_operand.vmem [shape: f32[1,512], index: 3, kind: input, shape index: {}]   ;;  %s2874_s4 = inlined_call_operand.vmem [shape: f32[64,128], index: 4, kind: output, shape index: {}]  }
   0x1   :  { %s17_s17 = sshll.u32 %s2871_s1, 4  ;;  %s18_s17 = int_to_ptr.hbm [resolvable:$true] %s17_s17 }
   0x2   :  { %10 = vsyncpa [#allocation6], 0  ;;  %s1921_s18 = smov [#allocation3]   ;;  %s30_s22 = sshll.u32 %s2872_s2, 4  ;;  %s31_s22 = int_to_ptr.hbm [resolvable:$true] %s30_s22 }
   0x3   :  { %s19_s19 = sshll.u32 %s1921_s18, 4  ;;  %s1922_s23 = smov 512   ;;  %s20_s19 = int_to_ptr.vmem [resolvable:$true] %s19_s19 }
   0x4   :  { %s1923_s24 = smov 32   ;;  %s1924_s25 = smov [#allocation5]  }
   0x5   :  { %25 = dma.hbm_to_vmem [thread:$0]  %s18_s17, 8192, %s20_s19, [#allocation4], %s1922_s23, %s1922_s23, %s1923_s24  }
   0x6   :  { %s32_s26 = sshll.u32 %s1924_s25, 4  ;;  %s33_s26 = int_to_ptr.vmem [resolvable:$true] %s32_s26 }
   0x7   :  { %38 = dma.hbm_to_vmem [thread:$0]  %s31_s22, 8192, %s33_s26, [#allocation6], %s1922_s23, %s1922_s23, %s1923_s24  }
   0x8   :  { %1917 = dma.done.wait [#allocation4], 8192  }
   0x9   :  { %1918 = vsyncadd [#allocation4], 4294959104 }
   0xa   :  { %1919 = dma.done.wait [#allocation6], 8192  }
   0xb   :  { %1920 = vsyncadd [#allocation6], 4294959104  ;;  %v117_v0 = vld [vmem:[#allocation3 + $0x1e0] sm:$0xff]  ;;  %v118_v1 = vld [vmem:[#allocation3 + $0x1e8] sm:$0xff] }
   0xc   :  { %v119_v2 = vld [vmem:[#allocation3 + $0x1f0] sm:$0xff]  ;;  %131 = vmatpush.msra.mxu0 %v117_v0  ;;  %172 = vmatpush.msra.mxu1 %v118_v1  ;;  %v120_v3 = vld [vmem:[#allocation3 + $0x1f8] sm:$0xff]  ;;  %v113_v4 = vld [vmem:[#allocation3 + $0x1c0] sm:$0xff] }
   0xd   :  { %v114_v5 = vld [vmem:[#allocation3 + $0x1c8] sm:$0xff]  ;;  %213 = vmatpush.msra.mxu2 %v119_v2  ;;  %254 = vmatpush.msra.mxu3 %v120_v3  ;;  %v115_v6 = vld [vmem:[#allocation3 + $0x1d0] sm:$0xff]  ;;  %v116_v7 = vld [vmem:[#allocation3 + $0x1d8] sm:$0xff] }
   0xe   :  { %v109_v8 = vld [vmem:[#allocation3 + $0x1a0] sm:$0xff]  ;;  %132 = vmatpush.msra.mxu0 %v113_v4  ;;  %173 = vmatpush.msra.mxu1 %v114_v5  ;;  %v110_v9 = vld [vmem:[#allocation3 + $0x1a8] sm:$0xff]  ;;  %v111_v10 = vld [vmem:[#allocation3 + $0x1b0] sm:$0xff] }
   0xf   :  { %v112_v11 = vld [vmem:[#allocation3 + $0x1b8] sm:$0xff]  ;;  %214 = vmatpush.msra.mxu2 %v115_v6  ;;  %255 = vmatpush.msra.mxu3 %v116_v7  ;;  %v105_v12 = vld [vmem:[#allocation3 + $0x180] sm:$0xff]  ;;  %v106_v13 = vld [vmem:[#allocation3 + $0x188] sm:$0xff] }
  0x10   :  { %133 = vmatpush.msra.mxu0 %v109_v8  ;;  %174 = vmatpush.msra.mxu1 %v110_v9  ;;  %v107_v14 = vld [vmem:[#allocation3 + $0x190] sm:$0xff]  ;;  %v108_v15 = vld [vmem:[#allocation3 + $0x198] sm:$0xff]  ;;  %v101_v16 = vld [vmem:[#allocation3 + $0x160] sm:$0xff] }
  0x11   :  { %215 = vmatpush.msra.mxu2 %v111_v10  ;;  %256 = vmatpush.msra.mxu3 %v112_v11  ;;  %v102_v17 = vld [vmem:[#allocation3 + $0x168] sm:$0xff]  ;;  %v103_v18 = vld [vmem:[#allocation3 + $0x170] sm:$0xff]  ;;  %v104_v19 = vld [vmem:[#allocation3 + $0x178] sm:$0xff] }
  0x12   :  { %134 = vmatpush.msra.mxu0 %v105_v12  ;;  %175 = vmatpush.msra.mxu1 %v106_v13  ;;  %v97_v20 = vld [vmem:[#allocation3 + $0x140] sm:$0xff]  ;;  %v98_v21 = vld [vmem:[#allocation3 + $0x148] sm:$0xff]  ;;  %v99_v22 = vld [vmem:[#allocation3 + $0x150] sm:$0xff] }
  0x13   :  { %216 = vmatpush.msra.mxu2 %v107_v14  ;;  %257 = vmatpush.msra.mxu3 %v108_v15  ;;  %v100_v23 = vld [vmem:[#allocation3 + $0x158] sm:$0xff]  ;;  %v93_v24 = vld [vmem:[#allocation3 + $0x120] sm:$0xff]  ;;  %v94_v25 = vld [vmem:[#allocation3 + $0x128] sm:$0xff] }
  0x14   :  { %135 = vmatpush.msra.mxu0 %v101_v16  ;;  %176 = vmatpush.msra.mxu1 %v102_v17  ;;  %v95_v26 = vld [vmem:[#allocation3 + $0x130] sm:$0xff]  ;;  %v96_v27 = vld [vmem:[#allocation3 + $0x138] sm:$0xff]  ;;  %v89_v28 = vld [vmem:[#allocation3 + $0x100] sm:$0xff] }
  0x15   :  { %217 = vmatpush.msra.mxu2 %v103_v18  ;;  %258 = vmatpush.msra.mxu3 %v104_v19  ;;  %v90_v29 = vld [vmem:[#allocation3 + $0x108] sm:$0xff]  ;;  %v91_v30 = vld [vmem:[#allocation3 + $0x110] sm:$0xff]  ;;  %v92_v31 = vld [vmem:[#allocation3 + $0x118] sm:$0xff] }
  0x16   :  { %136 = vmatpush.msra.mxu0 %v97_v20  ;;  %177 = vmatpush.msra.mxu1 %v98_v21  ;;  %v85_v32 = vld [vmem:[#allocation3 + $0xe0] sm:$0xff]  ;;  %v86_v33 = vld [vmem:[#allocation3 + $0xe8] sm:$0xff]  ;;  %v87_v34 = vld [vmem:[#allocation3 + $0xf0] sm:$0xff] }
  0x17   :  { %218 = vmatpush.msra.mxu2 %v99_v22  ;;  %259 = vmatpush.msra.mxu3 %v100_v23  ;;  %v88_v35 = vld [vmem:[#allocation3 + $0xf8] sm:$0xff]  ;;  %v81_v36 = vld [vmem:[#allocation3 + $0xc0] sm:$0xff]  ;;  %v82_v37 = vld [vmem:[#allocation3 + $0xc8] sm:$0xff] }
  0x18   :  { %137 = vmatpush.msra.mxu0 %v93_v24  ;;  %178 = vmatpush.msra.mxu1 %v94_v25  ;;  %v83_v38 = vld [vmem:[#allocation3 + $0xd0] sm:$0xff]  ;;  %v84_v39 = vld [vmem:[#allocation3 + $0xd8] sm:$0xff]  ;;  %v77_v40 = vld [vmem:[#allocation3 + $0xa0] sm:$0xff] }
  0x19   :  { %219 = vmatpush.msra.mxu2 %v95_v26  ;;  %260 = vmatpush.msra.mxu3 %v96_v27  ;;  %v78_v41 = vld [vmem:[#allocation3 + $0xa8] sm:$0xff]  ;;  %v79_v42 = vld [vmem:[#allocation3 + $0xb0] sm:$0xff]  ;;  %v80_v43 = vld [vmem:[#allocation3 + $0xb8] sm:$0xff] }
  0x1a   :  { %138 = vmatpush.msra.mxu0 %v89_v28  ;;  %179 = vmatpush.msra.mxu1 %v90_v29  ;;  %v73_v44 = vld [vmem:[#allocation3 + $0x80] sm:$0xff]  ;;  %v74_v45 = vld [vmem:[#allocation3 + $0x88] sm:$0xff]  ;;  %v75_v46 = vld [vmem:[#allocation3 + $0x90] sm:$0xff] }
  0x1b   :  { %220 = vmatpush.msra.mxu2 %v91_v30  ;;  %261 = vmatpush.msra.mxu3 %v92_v31  ;;  %v76_v47 = vld [vmem:[#allocation3 + $0x98] sm:$0xff]  ;;  %v69_v48 = vld [vmem:[#allocation3 + $0x60] sm:$0xff]  ;;  %v70_v49 = vld [vmem:[#allocation3 + $0x68] sm:$0xff] }
  0x1c   :  { %139 = vmatpush.msra.mxu0 %v85_v32  ;;  %180 = vmatpush.msra.mxu1 %v86_v33  ;;  %v71_v50 = vld [vmem:[#allocation3 + $0x70] sm:$0xff]  ;;  %v72_v51 = vld [vmem:[#allocation3 + $0x78] sm:$0xff]  ;;  %v65_v52 = vld [vmem:[#allocation3 + $0x40] sm:$0xff] }
  0x1d   :  { %221 = vmatpush.msra.mxu2 %v87_v34  ;;  %262 = vmatpush.msra.mxu3 %v88_v35  ;;  %v66_v53 = vld [vmem:[#allocation3 + $0x48] sm:$0xff]  ;;  %v67_v54 = vld [vmem:[#allocation3 + $0x50] sm:$0xff]  ;;  %v68_v55 = vld [vmem:[#allocation3 + $0x58] sm:$0xff] }
  0x1e   :  { %140 = vmatpush.msra.mxu0 %v81_v36  ;;  %181 = vmatpush.msra.mxu1 %v82_v37  ;;  %v61_v56 = vld [vmem:[#allocation3 + $0x20] sm:$0xff]  ;;  %v62_v57 = vld [vmem:[#allocation3 + $0x28] sm:$0xff]  ;;  %v63_v58 = vld [vmem:[#allocation3 + $0x30] sm:$0xff] }
  0x1f   :  { %222 = vmatpush.msra.mxu2 %v83_v38  ;;  %263 = vmatpush.msra.mxu3 %v84_v39  ;;  %v64_v59 = vld [vmem:[#allocation3 + $0x38] sm:$0xff]  ;;  %v57_v60 = vld [vmem:[#allocation3] sm:$0xff]  ;;  %v58_v61 = vld [vmem:[#allocation3 + $0x8] sm:$0xff] }
  0x20   :  { %141 = vmatpush.msra.mxu0 %v77_v40  ;;  %182 = vmatpush.msra.mxu1 %v78_v41  ;;  %v59_v62 = vld [vmem:[#allocation3 + $0x10] sm:$0xff]  ;;  %v60_v63 = vld [vmem:[#allocation3 + $0x18] sm:$0xff]  ;;  %v1960_v0 = vld [vmem:[%s2870_s0] sm:$0xff] }
  0x21   :  { %223 = vmatpush.msra.mxu2 %v79_v42  ;;  %264 = vmatpush.msra.mxu3 %v80_v43  ;;  %2920 = vst [vmem:[#allocation9_spill] sm:$0xff] %v1960_v0  ;;  %v1962_v1 = vld [vmem:[#allocation5 + $0x1e0] sm:$0xff]  ;;  %v1964_v2 = vld [vmem:[#allocation5 + $0x1e8] sm:$0xff]  ;;  %v1968_v3 = vld [vmem:[#allocation5 + $0x1f0] sm:$0xff] }
  0x22   :  { %142 = vmatpush.msra.mxu0 %v73_v44  ;;  %183 = vmatpush.msra.mxu1 %v74_v45  ;;  %v1970_v4 = vld [vmem:[#allocation5 + $0x1f8] sm:$0xff]  ;;  %v1974_v5 = vld [vmem:[#allocation5 + $0x1c0] sm:$0xff]  ;;  %v1976_v6 = vld [vmem:[#allocation5 + $0x1c8] sm:$0xff] }
  0x23   :  { %224 = vmatpush.msra.mxu2 %v75_v46  ;;  %265 = vmatpush.msra.mxu3 %v76_v47  ;;  %v1980_v7 = vld [vmem:[#allocation5 + $0x1d0] sm:$0xff]  ;;  %v1982_v8 = vld [vmem:[#allocation5 + $0x1d8] sm:$0xff]  ;;  %v1986_v9 = vld [vmem:[#allocation5 + $0x1a0] sm:$0xff] }
  0x24   :  { %143 = vmatpush.msra.mxu0 %v69_v48  ;;  %184 = vmatpush.msra.mxu1 %v70_v49  ;;  %v1988_v10 = vld [vmem:[#allocation5 + $0x1a8] sm:$0xff]  ;;  %v1992_v11 = vld [vmem:[#allocation5 + $0x1b0] sm:$0xff]  ;;  %v1994_v12 = vld [vmem:[#allocation5 + $0x1b8] sm:$0xff] }
  0x25   :  { %225 = vmatpush.msra.mxu2 %v71_v50  ;;  %266 = vmatpush.msra.mxu3 %v72_v51  ;;  %v2000_v13 = vld [vmem:[%s2870_s0 + $0x8] sm:$0xff]  ;;  %v2006_v14 = vld [vmem:[#allocation5 + $0x180] sm:$0xff]  ;;  %v2013_v16 = vld [vmem:[#allocation5 + $0x190] sm:$0xff] }
  0x26   :  { %144 = vmatpush.msra.mxu0 %v65_v52  ;;  %185 = vmatpush.msra.mxu1 %v66_v53  ;;  %2921 = vst [vmem:[#allocation10_spill] sm:$0xff] %v2000_v13  ;;  %v2008_v15 = vld [vmem:[#allocation5 + $0x188] sm:$0xff]  ;;  %v2015_v17 = vld [vmem:[#allocation5 + $0x198] sm:$0xff]  ;;  %v2019_v18 = vld [vmem:[#allocation5 + $0x160] sm:$0xff] }
  0x27   :  { %226 = vmatpush.msra.mxu2 %v67_v54  ;;  %267 = vmatpush.msra.mxu3 %v68_v55  ;;  %v2021_v19 = vld [vmem:[#allocation5 + $0x168] sm:$0xff]  ;;  %v2025_v20 = vld [vmem:[#allocation5 + $0x170] sm:$0xff]  ;;  %v2027_v21 = vld [vmem:[#allocation5 + $0x178] sm:$0xff] }
  0x28   :  { %145 = vmatpush.msra.mxu0 %v61_v56  ;;  %186 = vmatpush.msra.mxu1 %v62_v57  ;;  %v2031_v22 = vld [vmem:[#allocation5 + $0x140] sm:$0xff]  ;;  %v2033_v23 = vld [vmem:[#allocation5 + $0x148] sm:$0xff]  ;;  %v2037_v24 = vld [vmem:[#allocation5 + $0x150] sm:$0xff] }
  0x29   :  { %227 = vmatpush.msra.mxu2 %v63_v58  ;;  %268 = vmatpush.msra.mxu3 %v64_v59  ;;  %v2039_v25 = vld [vmem:[#allocation5 + $0x158] sm:$0xff]  ;;  %v51_v26 = vld [vmem:[%s2870_s0 + $0x10] sm:$0xff]  ;;  %v2049_v27 = vld [vmem:[#allocation5 + $0x120] sm:$0xff] }
  0x2a   :  { %146 = vmatpush.msra.mxu0 %v57_v60  ;;  %187 = vmatpush.msra.mxu1 %v58_v61  ;;  %v2051_v28 = vld [vmem:[#allocation5 + $0x128] sm:$0xff]  ;;  %v2054_v29 = vld [vmem:[#allocation5 + $0x130] sm:$0xff]  ;;  %v2056_v30 = vld [vmem:[#allocation5 + $0x138] sm:$0xff] }
  0x2b   :  { %228 = vmatpush.msra.mxu2 %v59_v62  ;;  %269 = vmatpush.msra.mxu3 %v60_v63  ;;  %v2058_v31 = vld [vmem:[#allocation5 + $0x100] sm:$0xff]  ;;  %v2060_v32 = vld [vmem:[#allocation5 + $0x108] sm:$0xff]  ;;  %v2064_v33 = vld [vmem:[#allocation5 + $0x110] sm:$0xff] }
  0x2c   :  { %147 = vmatmul.f32.vlgmr.msra.gmra.mxu0 %v1960_v0  ;;  %188 = vmatmul.f32.vlgmr.msra.gmra.mxu1 %v1960_v0  ;;  %v2066_v34 = vld [vmem:[#allocation5 + $0x118] sm:$0xff]  ;;  %v2070_v35 = vld [vmem:[#allocation5 + $0xe0] sm:$0xff]  ;;  %v2072_v36 = vld [vmem:[#allocation5 + $0xe8] sm:$0xff] }
  0x2d   :  { %229 = vmatmul.f32.vlgmr.msra.gmra.mxu2 %v1960_v0  ;;  %270 = vmatmul.f32.vlgmr.msra.gmra.mxu3 %v1960_v0  ;;  %v2076_v37 = vld [vmem:[#allocation5 + $0xf0] sm:$0xff]  ;;  %v2078_v38 = vld [vmem:[#allocation5 + $0xf8] sm:$0xff]  ;;  %v2088_v40 = vld [vmem:[#allocation5 + $0xc0] sm:$0xff] }
  0x2e   :  { %398 = vmatpush.msrb.mxu0 %v1962_v1  ;;  %418 = vmatpush.msrb.mxu1 %v1964_v2  ;;  %v52_v39 = vld [vmem:[%s2870_s0 + $0x18] sm:$0xff]  ;;  %v2090_v41 = vld [vmem:[#allocation5 + $0xc8] sm:$0xff]  ;;  %v2093_v42 = vld [vmem:[#allocation5 + $0xd0] sm:$0xff] }
  0x2f   :  { %438 = vmatpush.msrb.mxu2 %v1968_v3  ;;  %458 = vmatpush.msrb.mxu3 %v1970_v4  ;;  %v2095_v43 = vld [vmem:[#allocation5 + $0xd8] sm:$0xff]  ;;  %v2097_v44 = vld [vmem:[#allocation5 + $0xa0] sm:$0xff]  ;;  %v2099_v45 = vld [vmem:[#allocation5 + $0xa8] sm:$0xff] }
  0x30   :  { %399 = vmatpush.msrb.mxu0 %v1974_v5  ;;  %419 = vmatpush.msrb.mxu1 %v1976_v6  ;;  %v2103_v46 = vld [vmem:[#allocation5 + $0xb0] sm:$0xff]  ;;  %v2105_v47 = vld [vmem:[#allocation5 + $0xb8] sm:$0xff]  ;;  %v2109_v48 = vld [vmem:[#allocation5 + $0x80] sm:$0xff] }
  0x31   :  { %439 = vmatpush.msrb.mxu2 %v1980_v7  ;;  %459 = vmatpush.msrb.mxu3 %v1982_v8  ;;  %v2111_v49 = vld [vmem:[#allocation5 + $0x88] sm:$0xff]  ;;  %v2115_v50 = vld [vmem:[#allocation5 + $0x90] sm:$0xff]  ;;  %v2117_v51 = vld [vmem:[#allocation5 + $0x98] sm:$0xff] }
  0x32   :  { %400 = vmatpush.msrb.mxu0 %v1986_v9  ;;  %420 = vmatpush.msrb.mxu1 %v1988_v10  ;;  %v53_v52 = vld [vmem:[%s2870_s0 + $0x20] sm:$0xff]  ;;  %v2129_v54 = vld [vmem:[#allocation5 + $0x68] sm:$0xff]  ;;  %v2132_v55 = vld [vmem:[#allocation5 + $0x70] sm:$0xff] }
  0x33   :  { %440 = vmatpush.msrb.mxu2 %v1992_v11  ;;  %460 = vmatpush.msrb.mxu3 %v1994_v12  ;;  %v2127_v53 = vld [vmem:[#allocation5 + $0x60] sm:$0xff]  ;;  %v2134_v56 = vld [vmem:[#allocation5 + $0x78] sm:$0xff]  ;;  %v2138_v58 = vld [vmem:[#allocation5 + $0x48] sm:$0xff] }
  0x34   :  { %150 = vmatmul.f32.gmra.mxu0 %v2000_v13  ;;  %191 = vmatmul.f32.gmra.mxu1 %v2000_v13  ;;  %v2136_v57 = vld [vmem:[#allocation5 + $0x40] sm:$0xff]  ;;  %2922 = vst [vmem:[#allocation11_spill] sm:$0xff] %v2138_v58  ;;  %v2142_v59 = vld [vmem:[#allocation5 + $0x50] sm:$0xff]  ;;  %v2144_v60 = vld [vmem:[#allocation5 + $0x58] sm:$0xff] }
  0x35   :  { %232 = vmatmul.f32.gmra.mxu2 %v2000_v13  ;;  %273 = vmatmul.f32.gmra.mxu3 %v2000_v13  ;;  %v2148_v61 = vld [vmem:[#allocation5 + $0x20] sm:$0xff]  ;;  %v2150_v62 = vld [vmem:[#allocation5 + $0x28] sm:$0xff]  ;;  %v2154_v63 = vld [vmem:[#allocation5 + $0x30] sm:$0xff] }
  0x36   :  { %401 = vmatpush.msrb.mxu0 %v2006_v14  ;;  %421 = vmatpush.msrb.mxu1 %v2008_v15  ;;  %v2168_v13 = vld [vmem:[#allocation5 + $0x8] sm:$0xff]  ;;  %v2171_v0 = vld [vmem:[#allocation5 + $0x10] sm:$0xff] }
  0x37   :  { %441 = vmatpush.msrb.mxu2 %v2013_v16  ;;  %461 = vmatpush.msrb.mxu3 %v2015_v17 }
  0x38   :  { %402 = vmatpush.msrb.mxu0 %v2019_v18  ;;  %422 = vmatpush.msrb.mxu1 %v2021_v19 }
  0x39   :  { %442 = vmatpush.msrb.mxu2 %v2025_v20  ;;  %462 = vmatpush.msrb.mxu3 %v2027_v21 }
  0x3a   :  { %403 = vmatpush.msrb.mxu0 %v2031_v22  ;;  %423 = vmatpush.msrb.mxu1 %v2033_v23 }
  0x3b   :  { %443 = vmatpush.msrb.mxu2 %v2037_v24  ;;  %463 = vmatpush.msrb.mxu3 %v2039_v25 }
  0x3c   :  { %153 = vmatmul.f32.gmra.mxu0 %v51_v26  ;;  %194 = vmatmul.f32.gmra.mxu1 %v51_v26 }
  0x3d   :  { %235 = vmatmul.f32.gmra.mxu2 %v51_v26  ;;  %276 = vmatmul.f32.gmra.mxu3 %v51_v26  ;;  %v2156_v26 = vld [vmem:[#allocation5 + $0x38] sm:$0xff] }
  0x3e   :  { %404 = vmatpush.msrb.mxu0 %v2049_v27  ;;  %424 = vmatpush.msrb.mxu1 %v2051_v28  ;;  %2923 = vst [vmem:[#allocation12_spill] sm:$0xff] %v2156_v26 }
  0x3f   :  { %444 = vmatpush.msrb.mxu2 %v2054_v29  ;;  %464 = vmatpush.msrb.mxu3 %v2056_v30 }
  0x40   :  { %405 = vmatpush.msrb.mxu0 %v2058_v31  ;;  %425 = vmatpush.msrb.mxu1 %v2060_v32 }
  0x41   :  { %445 = vmatpush.msrb.mxu2 %v2064_v33  ;;  %465 = vmatpush.msrb.mxu3 %v2066_v34 }
  0x42   :  { %406 = vmatpush.msrb.mxu0 %v2070_v35  ;;  %426 = vmatpush.msrb.mxu1 %v2072_v36 }
  0x43   :  { %446 = vmatpush.msrb.mxu2 %v2076_v37  ;;  %466 = vmatpush.msrb.mxu3 %v2078_v38 }
  0x44   :  { %156 = vmatmul.f32.gmra.mxu0 %v52_v39  ;;  %197 = vmatmul.f32.gmra.mxu1 %v52_v39 }
  0x45   :  { %238 = vmatmul.f32.gmra.mxu2 %v52_v39  ;;  %279 = vmatmul.f32.gmra.mxu3 %v52_v39  ;;  %v54_v39 = vld [vmem:[%s2870_s0 + $0x28] sm:$0xff] }
  0x46   :  { %407 = vmatpush.msrb.mxu0 %v2088_v40  ;;  %427 = vmatpush.msrb.mxu1 %v2090_v41 }
  0x47   :  { %447 = vmatpush.msrb.mxu2 %v2093_v42  ;;  %467 = vmatpush.msrb.mxu3 %v2095_v43 }
  0x48   :  { %408 = vmatpush.msrb.mxu0 %v2097_v44  ;;  %428 = vmatpush.msrb.mxu1 %v2099_v45 }
  0x49   :  { %448 = vmatpush.msrb.mxu2 %v2103_v46  ;;  %468 = vmatpush.msrb.mxu3 %v2105_v47 }
  0x4a   :  { %409 = vmatpush.msrb.mxu0 %v2109_v48  ;;  %429 = vmatpush.msrb.mxu1 %v2111_v49 }
  0x4b   :  { %449 = vmatpush.msrb.mxu2 %v2115_v50  ;;  %469 = vmatpush.msrb.mxu3 %v2117_v51 }
  0x4c   :  { %159 = vmatmul.f32.gmra.mxu0 %v53_v52  ;;  %200 = vmatmul.f32.gmra.mxu1 %v53_v52 }
  0x4d   :  { %241 = vmatmul.f32.gmra.mxu2 %v53_v52  ;;  %282 = vmatmul.f32.gmra.mxu3 %v53_v52  ;;  %v2166_v52 = vld [vmem:[#allocation5] sm:$0xff] }
  0x4e   :  { %410 = vmatpush.msrb.mxu0 %v2127_v53  ;;  %430 = vmatpush.msrb.mxu1 %v2129_v54 }
  0x4f   :  { %450 = vmatpush.msrb.mxu2 %v2132_v55  ;;  %470 = vmatpush.msrb.mxu3 %v2134_v56 }
  0x50   :  { %411 = vmatpush.msrb.mxu0 %v2136_v57  ;;  %431 = vmatpush.msrb.mxu1 %v2138_v58  ;;  %v2173_v58 = vld [vmem:[#allocation5 + $0x18] sm:$0xff] }
  0x51   :  { %451 = vmatpush.msrb.mxu2 %v2142_v59  ;;  %471 = vmatpush.msrb.mxu3 %v2144_v60 }
  0x52   :  { %412 = vmatpush.msrb.mxu0 %v2148_v61  ;;  %432 = vmatpush.msrb.mxu1 %v2150_v62 }
  0x53   :  { %452 = vmatpush.msrb.mxu2 %v2154_v63  ;;  %472 = vmatpush.msrb.mxu3 %v2156_v26  ;;  %v55_v26 = vld [vmem:[%s2870_s0 + $0x30] sm:$0xff] }
  0x54   :  { %162 = vmatmul.f32.gmra.mxu0 %v54_v39  ;;  %203 = vmatmul.f32.gmra.mxu1 %v54_v39 }
  0x55   :  { %244 = vmatmul.f32.gmra.mxu2 %v54_v39  ;;  %285 = vmatmul.f32.gmra.mxu3 %v54_v39  ;;  %v56_v39 = vld [vmem:[%s2870_s0 + $0x38] sm:$0xff] }
  0x56   :  { %413 = vmatpush.msrb.mxu0 %v2166_v52  ;;  %433 = vmatpush.msrb.mxu1 %v2168_v13 }
  0x57   :  { %453 = vmatpush.msrb.mxu2 %v2171_v0  ;;  %473 = vmatpush.msrb.mxu3 %v2173_v58 }
  0x58   :  { %575 = vmatpush.msra.mxu0 %v1962_v1  ;;  %595 = vmatpush.msra.mxu1 %v1964_v2 }
  0x59   :  { %615 = vmatpush.msra.mxu2 %v1968_v3  ;;  %635 = vmatpush.msra.mxu3 %v1970_v4 }
  0x5a   :  { %576 = vmatpush.msra.mxu0 %v1974_v5  ;;  %596 = vmatpush.msra.mxu1 %v1976_v6 }
  0x5b   :  { %616 = vmatpush.msra.mxu2 %v1980_v7  ;;  %636 = vmatpush.msra.mxu3 %v1982_v8 }
  0x5c   :  { %165 = vmatmul.f32.gmra.mxu0 %v55_v26  ;;  %206 = vmatmul.f32.gmra.mxu1 %v55_v26 }
  0x5d   :  { %247 = vmatmul.f32.gmra.mxu2 %v55_v26  ;;  %288 = vmatmul.f32.gmra.mxu3 %v55_v26  ;;  %v1925_v26 = vmov 0.0  }
  0x5e   :  { %577 = vmatpush.msra.mxu0 %v1986_v9  ;;  %597 = vmatpush.msra.mxu1 %v1988_v10 }
  0x5f   :  { %617 = vmatpush.msra.mxu2 %v1992_v11  ;;  %637 = vmatpush.msra.mxu3 %v1994_v12 }
  0x60   :  { %578 = vmatpush.msra.mxu0 %v2006_v14  ;;  %598 = vmatpush.msra.mxu1 %v2008_v15 }
  0x61   :  { %618 = vmatpush.msra.mxu2 %v2013_v16  ;;  %638 = vmatpush.msra.mxu3 %v2015_v17 }
  0x62   :  { %579 = vmatpush.msra.mxu0 %v2019_v18  ;;  %599 = vmatpush.msra.mxu1 %v2021_v19 }
  0x63   :  { %619 = vmatpush.msra.mxu2 %v2025_v20  ;;  %639 = vmatpush.msra.mxu3 %v2027_v21 }
  0x64   :  { %168 = vmatmul.f32.gmra.mxu0 %v56_v39  ;;  %209 = vmatmul.f32.gmra.mxu1 %v56_v39 }
  0x65   :  { %250 = vmatmul.f32.gmra.mxu2 %v56_v39  ;;  %291 = vmatmul.f32.gmra.mxu3 %v56_v39  ;;  %v2924_v39 = vld [vmem:[#allocation11_spill] sm:$0xff] }
  0x66   :  { %580 = vmatpush.msra.mxu0 %v2031_v22  ;;  %600 = vmatpush.msra.mxu1 %v2033_v23 }
  0x67   :  { %620 = vmatpush.msra.mxu2 %v2037_v24  ;;  %640 = vmatpush.msra.mxu3 %v2039_v25 }
  0x68   :  { %581 = vmatpush.msra.mxu0 %v2049_v27  ;;  %601 = vmatpush.msra.mxu1 %v2051_v28 }
  0x69   :  { %621 = vmatpush.msra.mxu2 %v2054_v29  ;;  %641 = vmatpush.msra.mxu3 %v2056_v30 }
  0x6a   :  { %582 = vmatpush.msra.mxu0 %v2058_v31  ;;  %602 = vmatpush.msra.mxu1 %v2060_v32 }
  0x6b   :  { %622 = vmatpush.msra.mxu2 %v2064_v33  ;;  %642 = vmatpush.msra.mxu3 %v2066_v34 }
  0x6c   :  { %414 = vmatmul.f32.vlgmr.msrb.gmra.mxu0 %v1925_v26  ;;  %434 = vmatmul.f32.vlgmr.msrb.gmra.mxu1 %v1925_v26 }
  0x6d   :  { %454 = vmatmul.f32.vlgmr.msrb.gmra.mxu2 %v1925_v26  ;;  %474 = vmatmul.f32.vlgmr.msrb.gmra.mxu3 %v1925_v26  ;;  %v2925_v26 = vld [vmem:[#allocation12_spill] sm:$0xff] }
  0x6e   :  { %583 = vmatpush.msra.mxu0 %v2070_v35  ;;  %603 = vmatpush.msra.mxu1 %v2072_v36 }
  0x6f   :  { %623 = vmatpush.msra.mxu2 %v2076_v37  ;;  %643 = vmatpush.msra.mxu3 %v2078_v38 }
  0x70   :  { %584 = vmatpush.msra.mxu0 %v2088_v40  ;;  %604 = vmatpush.msra.mxu1 %v2090_v41 }
  0x71   :  { %624 = vmatpush.msra.mxu2 %v2093_v42  ;;  %644 = vmatpush.msra.mxu3 %v2095_v43 }
  0x72   :  { %585 = vmatpush.msra.mxu0 %v2097_v44  ;;  %605 = vmatpush.msra.mxu1 %v2099_v45 }
  0x73   :  { %625 = vmatpush.msra.mxu2 %v2103_v46  ;;  %645 = vmatpush.msra.mxu3 %v2105_v47 }
  0x74   :  { %586 = vmatpush.msra.mxu0 %v2109_v48  ;;  %606 = vmatpush.msra.mxu1 %v2111_v49 }
  0x75   :  { %626 = vmatpush.msra.mxu2 %v2115_v50  ;;  %646 = vmatpush.msra.mxu3 %v2117_v51 }
  0x76   :  { %587 = vmatpush.msra.mxu0 %v2127_v53  ;;  %607 = vmatpush.msra.mxu1 %v2129_v54 }
  0x77   :  { %627 = vmatpush.msra.mxu2 %v2132_v55  ;;  %647 = vmatpush.msra.mxu3 %v2134_v56 }
  0x78   :  { %588 = vmatpush.msra.mxu0 %v2136_v57  ;;  %608 = vmatpush.msra.mxu1 %v2924_v39 }
  0x79   :  { %628 = vmatpush.msra.mxu2 %v2142_v59  ;;  %648 = vmatpush.msra.mxu3 %v2144_v60 }
  0x7a   :  { %589 = vmatpush.msra.mxu0 %v2148_v61  ;;  %609 = vmatpush.msra.mxu1 %v2150_v62 }
  0x7b   :  { %629 = vmatpush.msra.mxu2 %v2154_v63  ;;  %649 = vmatpush.msra.mxu3 %v2925_v26 }
  0x7c   :  { %590 = vmatpush.msra.mxu0 %v2166_v52  ;;  %610 = vmatpush.msra.mxu1 %v2168_v13 }
  0x7d   :  { %630 = vmatpush.msra.mxu2 %v2171_v0  ;;  %650 = vmatpush.msra.mxu3 %v2173_v58 }
  0x7e   :  { %754 = vmatpush.msrb.mxu0 %v1962_v1  ;;  %774 = vmatpush.msrb.mxu1 %v1964_v2 }
  0x7f   :  { %794 = vmatpush.msrb.mxu2 %v1968_v3  ;;  %814 = vmatpush.msrb.mxu3 %v1970_v4  ;;  %v121_v3 = vld [vmem:[%s2873_s3] sm:$0xf] }
  0x80   :  { %755 = vmatpush.msrb.mxu0 %v1974_v5  ;;  %775 = vmatpush.msrb.mxu1 %v1976_v6  ;;  %v123_v4 = vperm.slane %v121_v3, 0  ;;  %v124_v5 = vperm.slane %v121_v3, 1 }
  0x81   :  { %795 = vmatpush.msrb.mxu2 %v1980_v7  ;;  %815 = vmatpush.msrb.mxu3 %v1982_v8 }
  0x82   :  { %756 = vmatpush.msrb.mxu0 %v1986_v9  ;;  %776 = vmatpush.msrb.mxu1 %v1988_v10 }
  0x83   :  { %796 = vmatpush.msrb.mxu2 %v1992_v11  ;;  %816 = vmatpush.msrb.mxu3 %v1994_v12  ;;  %v2326_v12 = vperm.slane %v121_v3, 3 }
  0x84   :  { %757 = vmatpush.msrb.mxu0 %v2006_v14  ;;  %777 = vmatpush.msrb.mxu1 %v2008_v15 }
  0x85   :  { %797 = vmatpush.msrb.mxu2 %v2013_v16  ;;  %817 = vmatpush.msrb.mxu3 %v2015_v17 }
  0x86   :  { %758 = vmatpush.msrb.mxu0 %v2019_v18  ;;  %778 = vmatpush.msrb.mxu1 %v2021_v19 }
  0x87   :  { %798 = vmatpush.msrb.mxu2 %v2025_v20  ;;  %818 = vmatpush.msrb.mxu3 %v2027_v21 }
  0x88   :  { %759 = vmatpush.msrb.mxu0 %v2031_v22  ;;  %779 = vmatpush.msrb.mxu1 %v2033_v23 }
  0x89   :  { %799 = vmatpush.msrb.mxu2 %v2037_v24  ;;  %819 = vmatpush.msrb.mxu3 %v2039_v25 }
  0x8a   :  { %760 = vmatpush.msrb.mxu0 %v2049_v27  ;;  %780 = vmatpush.msrb.mxu1 %v2051_v28 }
  0x8b   :  { %800 = vmatpush.msrb.mxu2 %v2054_v29  ;;  %820 = vmatpush.msrb.mxu3 %v2056_v30 }
  0x8c   :  { %761 = vmatpush.msrb.mxu0 %v2058_v31  ;;  %781 = vmatpush.msrb.mxu1 %v2060_v32 }
  0x8d   :  { %801 = vmatpush.msrb.mxu2 %v2064_v33  ;;  %821 = vmatpush.msrb.mxu3 %v2066_v34 }
  0x8e   :  { %762 = vmatpush.msrb.mxu0 %v2070_v35  ;;  %782 = vmatpush.msrb.mxu1 %v2072_v36 }
  0x8f   :  { %802 = vmatpush.msrb.mxu2 %v2076_v37  ;;  %822 = vmatpush.msrb.mxu3 %v2078_v38 }
  0x90   :  { %763 = vmatpush.msrb.mxu0 %v2088_v40  ;;  %783 = vmatpush.msrb.mxu1 %v2090_v41 }
  0x91   :  { %803 = vmatpush.msrb.mxu2 %v2093_v42  ;;  %823 = vmatpush.msrb.mxu3 %v2095_v43 }
  0x92   :  { %764 = vmatpush.msrb.mxu0 %v2097_v44  ;;  %784 = vmatpush.msrb.mxu1 %v2099_v45 }
  0x93   :  { %804 = vmatpush.msrb.mxu2 %v2103_v46  ;;  %824 = vmatpush.msrb.mxu3 %v2105_v47 }
  0x94   :  { %765 = vmatpush.msrb.mxu0 %v2109_v48  ;;  %785 = vmatpush.msrb.mxu1 %v2111_v49 }
  0x95   :  { %805 = vmatpush.msrb.mxu2 %v2115_v50  ;;  %825 = vmatpush.msrb.mxu3 %v2117_v51 }
  0x96   :  { %766 = vmatpush.msrb.mxu0 %v2127_v53  ;;  %786 = vmatpush.msrb.mxu1 %v2129_v54 }
  0x97   :  { %806 = vmatpush.msrb.mxu2 %v2132_v55  ;;  %826 = vmatpush.msrb.mxu3 %v2134_v56 }
  0x98   :  { %767 = vmatpush.msrb.mxu0 %v2136_v57  ;;  %787 = vmatpush.msrb.mxu1 %v2924_v39 }
  0x99   :  { %807 = vmatpush.msrb.mxu2 %v2142_v59  ;;  %827 = vmatpush.msrb.mxu3 %v2144_v60 }
  0x9a   :  { %768 = vmatpush.msrb.mxu0 %v2148_v61  ;;  %788 = vmatpush.msrb.mxu1 %v2150_v62 }
  0x9b   :  { %808 = vmatpush.msrb.mxu2 %v2154_v63  ;;  %828 = vmatpush.msrb.mxu3 %v2925_v26 }
  0x9c   :  { %769 = vmatpush.msrb.mxu0 %v2166_v52  ;;  %789 = vmatpush.msrb.mxu1 %v2168_v13 }
  0x9d   :  { %809 = vmatpush.msrb.mxu2 %v2171_v0  ;;  %829 = vmatpush.msrb.mxu3 %v2173_v58  ;;  %v2324_v0 = vperm.slane %v121_v3, 2 }
  0xa9   :  { %v148_v1 = vpop.f32.mrf.mxu0  ;;  %v189_v2 = vpop.f32.mrf.mxu1 }
  0xaa   :  { %v149_v52 = vadd.f32 %v148_v1, %v123_v4  ;;  %v190_v39 = vadd.f32 %v189_v2, %v124_v5 }
  0xb0   :  { %v2316_v6 = vpop.f32.mrf.mxu2  ;;  %v2318_v7 = vpop.f32.mrf.mxu3 }
  0xb1   :  { %v151_v8 = vpop.f32.mrf.mxu0  ;;  %v192_v9 = vpop.f32.mrf.mxu1  ;;  %v272_v1 = vadd.f32 %v2318_v7, %v2326_v12 }
  0xb2   :  { %v2320_v10 = vadd.f32 %v151_v8, %v123_v4  ;;  %v2322_v11 = vadd.f32 %v192_v9, %v124_v5 }
  0xb8   :  { %v233_v13 = vpop.f32.mrf.mxu2  ;;  %v274_v14 = vpop.f32.mrf.mxu3 }
  0xb9   :  { %v2329_v15 = vadd.f32 %v233_v13, %v2324_v0  ;;  %v2332_v16 = vadd.f32 %v274_v14, %v2326_v12  ;;  %v154_v17 = vpop.f32.mrf.mxu0  ;;  %v195_v18 = vpop.f32.mrf.mxu1 }
  0xba   :  { %v2334_v19 = vadd.f32 %v154_v17, %v123_v4  ;;  %v2336_v20 = vadd.f32 %v195_v18, %v124_v5 }
  0xc0   :  { %v236_v21 = vpop.f32.mrf.mxu2  ;;  %v277_v22 = vpop.f32.mrf.mxu3 }
  0xc1   :  { %v2339_v23 = vadd.f32 %v236_v21, %v2324_v0  ;;  %v2342_v24 = vadd.f32 %v277_v22, %v2326_v12  ;;  %v157_v25 = vpop.f32.mrf.mxu0  ;;  %v198_v27 = vpop.f32.mrf.mxu1 }
  0xc2   :  { %v2344_v28 = vadd.f32 %v157_v25, %v123_v4  ;;  %v2346_v29 = vadd.f32 %v198_v27, %v124_v5  ;;  %v231_v25 = vadd.f32 %v2316_v6, %v2324_v0 }
  0xc4   :  { %2926 = vst [vmem:[#allocation11_spill] sm:$0xff] %v2344_v28  ;;  %v2585_v28 = vld [vmem:[#allocation5 + $0x30] sm:$0xff] }
  0xc5   :  { %2927 = vst [vmem:[#allocation12_spill] sm:$0xff] %v2346_v29  ;;  %v2583_v29 = vld [vmem:[#allocation5 + $0x28] sm:$0xff] }
  0xc6   :  { %2962 = vst [vmem:[#allocation43_spill] sm:$0xff] %v2583_v29 }
  0xc7   :  { %2963 = vst [vmem:[#allocation44_spill] sm:$0xff] %v2585_v28 }
  0xc8   :  { %v239_v30 = vpop.f32.mrf.mxu2  ;;  %v280_v31 = vpop.f32.mrf.mxu3 }
  0xc9   :  { %v2349_v32 = vadd.f32 %v239_v30, %v2324_v0  ;;  %v2352_v33 = vadd.f32 %v280_v31, %v2326_v12  ;;  %v160_v34 = vpop.f32.mrf.mxu0  ;;  %v201_v35 = vpop.f32.mrf.mxu1 }
  0xca   :  { %v2354_v36 = vadd.f32 %v160_v34, %v123_v4  ;;  %v2356_v37 = vadd.f32 %v201_v35, %v124_v5 }
  0xcb   :  { %2928 = vst [vmem:[#allocation13_spill] sm:$0xff] %v2349_v32  ;;  %v2581_v32 = vld [vmem:[#allocation5 + $0x20] sm:$0xff] }
  0xcc   :  { %2929 = vst [vmem:[#allocation14_spill] sm:$0xff] %v2352_v33  ;;  %v2577_v33 = vld [vmem:[#allocation5 + $0x58] sm:$0xff] }
  0xcd   :  { %2930 = vst [vmem:[#allocation15_spill] sm:$0xff] %v2354_v36  ;;  %v2573_v36 = vld [vmem:[#allocation5 + $0x50] sm:$0xff] }
  0xce   :  { %2931 = vst [vmem:[#allocation16_spill] sm:$0xff] %v2356_v37  ;;  %v2571_v37 = vld [vmem:[#allocation5 + $0x48] sm:$0xff] }
  0xcf   :  { %2958 = vst [vmem:[#allocation39_spill] sm:$0xff] %v2571_v37 }
  0xd0   :  { %v242_v38 = vpop.f32.mrf.mxu2  ;;  %v283_v40 = vpop.f32.mrf.mxu3  ;;  %2959 = vst [vmem:[#allocation40_spill] sm:$0xff] %v2573_v36 }
  0xd1   :  { %v2359_v41 = vadd.f32 %v242_v38, %v2324_v0  ;;  %v2362_v42 = vadd.f32 %v283_v40, %v2326_v12  ;;  %v163_v43 = vpop.f32.mrf.mxu0  ;;  %v204_v44 = vpop.f32.mrf.mxu1  ;;  %2960 = vst [vmem:[#allocation41_spill] sm:$0xff] %v2577_v33 }
  0xd2   :  { %v2364_v45 = vadd.f32 %v163_v43, %v123_v4  ;;  %v2366_v46 = vadd.f32 %v204_v44, %v124_v5  ;;  %2961 = vst [vmem:[#allocation42_spill] sm:$0xff] %v2581_v32 }
  0xd3   :  { %2932 = vst [vmem:[#allocation17_spill] sm:$0xff] %v2359_v41  ;;  %v2569_v41 = vld [vmem:[#allocation5 + $0x40] sm:$0xff] }
  0xd4   :  { %2933 = vst [vmem:[#allocation18_spill] sm:$0xff] %v2362_v42  ;;  %v2565_v42 = vld [vmem:[#allocation5 + $0x78] sm:$0xff] }
  0xd5   :  { %2934 = vst [vmem:[#allocation19_spill] sm:$0xff] %v2364_v45  ;;  %v2561_v45 = vld [vmem:[#allocation5 + $0x70] sm:$0xff] }
  0xd6   :  { %2935 = vst [vmem:[#allocation20_spill] sm:$0xff] %v2366_v46  ;;  %v2559_v46 = vld [vmem:[#allocation5 + $0x68] sm:$0xff] }
  0xd7   :  { %2954 = vst [vmem:[#allocation35_spill] sm:$0xff] %v2559_v46 }
  0xd8   :  { %v245_v47 = vpop.f32.mrf.mxu2  ;;  %v286_v48 = vpop.f32.mrf.mxu3  ;;  %2955 = vst [vmem:[#allocation36_spill] sm:$0xff] %v2561_v45 }
  0xd9   :  { %v2369_v49 = vadd.f32 %v245_v47, %v2324_v0  ;;  %v2372_v50 = vadd.f32 %v286_v48, %v2326_v12  ;;  %v166_v51 = vpop.f32.mrf.mxu0  ;;  %v207_v53 = vpop.f32.mrf.mxu1  ;;  %2956 = vst [vmem:[#allocation37_spill] sm:$0xff] %v2565_v42 }
  0xda   :  { %v2374_v54 = vadd.f32 %v166_v51, %v123_v4  ;;  %v2376_v55 = vadd.f32 %v207_v53, %v124_v5  ;;  %2957 = vst [vmem:[#allocation38_spill] sm:$0xff] %v2569_v41 }
  0xdb   :  { %2936 = vst [vmem:[#allocation21_spill] sm:$0xff] %v2369_v49  ;;  %v2557_v49 = vld [vmem:[#allocation5 + $0x60] sm:$0xff] }
  0xdc   :  { %2937 = vst [vmem:[#allocation22_spill] sm:$0xff] %v2372_v50  ;;  %v2553_v50 = vld [vmem:[#allocation5 + $0x98] sm:$0xff] }
  0xdd   :  { %2938 = vst [vmem:[#allocation23_spill] sm:$0xff] %v2374_v54  ;;  %v2549_v54 = vld [vmem:[#allocation5 + $0x90] sm:$0xff] }
  0xde   :  { %2939 = vst [vmem:[#allocation24_spill] sm:$0xff] %v2376_v55  ;;  %v2547_v55 = vld [vmem:[#allocation5 + $0x88] sm:$0xff] }
  0xdf   :  { %2951 = vst [vmem:[#allocation32_spill] sm:$0xff] %v2549_v54 }
  0xe0   :  { %v248_v56 = vpop.f32.mrf.mxu2  ;;  %v289_v57 = vpop.f32.mrf.mxu3  ;;  %2952 = vst [vmem:[#allocation33_spill] sm:$0xff] %v2553_v50 }
  0xe1   :  { %v2379_v58 = vadd.f32 %v248_v56, %v2324_v0  ;;  %v2382_v59 = vadd.f32 %v289_v57, %v2326_v12  ;;  %v169_v60 = vpop.f32.mrf.mxu0  ;;  %v210_v61 = vpop.f32.mrf.mxu1  ;;  %v2946_v56 = vld [vmem:[#allocation9_spill] sm:$0xff]  ;;  %2953 = vst [vmem:[#allocation34_spill] sm:$0xff] %v2557_v49 }
  0xe2   :  { %v2384_v62 = vadd.f32 %v169_v60, %v123_v4  ;;  %v2386_v63 = vadd.f32 %v210_v61, %v124_v5 }
  0xe3   :  { %2940 = vst [vmem:[#allocation25_spill] sm:$0xff] %v2379_v58  ;;  %v2545_v58 = vld [vmem:[#allocation5 + $0x80] sm:$0xff] }
  0xe4   :  { %2941 = vst [vmem:[#allocation26_spill] sm:$0xff] %v2382_v59  ;;  %v2541_v59 = vld [vmem:[#allocation5 + $0xb8] sm:$0xff] }
  0xe5   :  { %2942 = vst [vmem:[#allocation27_spill] sm:$0xff] %v2384_v62  ;;  %v2537_v62 = vld [vmem:[#allocation5 + $0xb0] sm:$0xff] }
  0xe6   :  { %2943 = vst [vmem:[#allocation28_spill] sm:$0xff] %v2386_v63  ;;  %v2535_v63 = vld [vmem:[#allocation5 + $0xa8] sm:$0xff] }
  0xe8   :  { %v251_v26 = vpop.f32.mrf.mxu2  ;;  %v292_v3 = vpop.f32.mrf.mxu3 }
  0xe9   :  { %v2389_v8 = vadd.f32 %v251_v26, %v2324_v0  ;;  %v2392_v9 = vadd.f32 %v292_v3, %v2326_v12  ;;  %v415_v13 = vpop.f32.mrf.mxu0  ;;  %v435_v14 = vpop.f32.mrf.mxu1  ;;  %v2404_v3 = vld [vmem:[#allocation5 + $0x1e0] sm:$0xff] }
  0xea   :  { %v478_v17 = vadd.f32 %v415_v13, %v149_v52  ;;  %v479_v18 = vadd.f32 %v435_v14, %v190_v39  ;;  %2947 = vst [vmem:[#allocation9_spill] sm:$0xff] %v2404_v3  ;;  %v2406_v13 = vld [vmem:[#allocation5 + $0x1e8] sm:$0xff]  ;;  %v2408_v14 = vld [vmem:[#allocation5 + $0x1f0] sm:$0xff] }
  0xeb   :  { %2944 = vst [vmem:[#allocation29_spill] sm:$0xff] %v2389_v8  ;;  %v2533_v8 = vld [vmem:[#allocation5 + $0xa0] sm:$0xff] }
  0xec   :  { %2945 = vst [vmem:[#allocation30_spill] sm:$0xff] %v2392_v9  ;;  %v482_v21 = vmul.f32 0.5, %v478_v17  ;;  %v486_v22 = vmul.f32 0.5, %v479_v18  ;;  %v2529_v9 = vld [vmem:[#allocation5 + $0xd8] sm:$0xff] }
  0xed   :  { %2948 = vst [vmem:[#allocation31_spill] sm:$0xff] %v2406_v13 }
  0xee   :  { %1789 = vtanh.f32 %v482_v21  ;;  %v2412_v21 = vld [vmem:[#allocation5 + $0x1f8] sm:$0xff] }
  0xef   :  { %1791 = vtanh.f32 %v486_v22 }
  0xf0   :  { %v455_v2 = vpop.f32.mrf.mxu2  ;;  %v475_v4 = vpop.f32.mrf.mxu3 }
  0xf1   :  { %v480_v5 = vadd.f32 %v455_v2, %v231_v25  ;;  %v481_v27 = vadd.f32 %v475_v4, %v272_v1 }
  0xf3   :  { %1793 = vtanh.f32 %v480_v5  ;;  %v491_v30 = vmul.f32 0.5, %v481_v27 }
  0xf4   :  { %v1790_v31 = vpop.eup %1789 }
  0xf5   :  { %v1792_v34 = vpop.eup %1791  ;;  %v484_v35 = vmul.f32 0.5, %v1790_v31  ;;  %1795 = vtanh.f32 %v491_v30 }
  0xf6   :  { %v488_v38 = vmul.f32 0.5, %v1792_v34 }
  0xf7   :  { %v485_v40 = vadd.f32 0.5, %v484_v35 }
  0xf8   :  { %v489_v43 = vadd.f32 0.5, %v488_v38 }
  0xf9   :  { %v1794_v44 = vpop.eup %1793 }
  0xfa   :  { %v495_v47 = vmul.f32 0.0, %v489_v43  ;;  %v496_v6 = vmul.f32 %v1794_v44, %v485_v40 }
  0xfb   :  { %v1796_v0 = vpop.eup %1795 }
  0xfc   :  { %v497_v48 = vadd.f32 %v496_v6, %v495_v47  ;;  %v493_v7 = vmul.f32 0.5, %v1796_v0  ;;  %v2949_v6 = vld [vmem:[#allocation10_spill] sm:$0xff] }
  0xfd   :  { %2950 = vst [vmem:[#allocation10_spill] sm:$0xff] %v2547_v55 }
  0xfe   :  { %1797 = vtanh.f32 %v497_v48  ;;  %v494_v12 = vadd.f32 0.5, %v493_v7 }
 0x104   :  { %v1798_v51 = vpop.eup %1797 }
 0x105   :  { %v499_v53 = vmul.f32 %v1798_v51, %v494_v12  ;;  %v2427_v12 = vld [vmem:[#allocation5 + $0x1c8] sm:$0xff]  ;;  %v2429_v51 = vld [vmem:[#allocation5 + $0x1d0] sm:$0xff] }
 0x107   :  { %v501_v57 = vadd.f32 %v499_v53, %v2946_v56  ;;  %591 = vmatmul.f32.vlgmr.msra.gmra.mxu0 %v499_v53  ;;  %611 = vmatmul.f32.vlgmr.msra.gmra.mxu1 %v499_v53  ;;  %v2437_v56 = vld [vmem:[#allocation5 + $0x1a0] sm:$0xff] }
 0x108   :  { %631 = vmatmul.f32.vlgmr.msra.gmra.mxu2 %v499_v53  ;;  %651 = vmatmul.f32.vlgmr.msra.gmra.mxu3 %v499_v53  ;;  %v2433_v53 = vld [vmem:[#allocation5 + $0x1d8] sm:$0xff] }
 0x109   :  { %v502_v60 = vmax.f32 %v501_v57, 0.0  ;;  %933 = vmatpush.msra.mxu0 %v2404_v3  ;;  %953 = vmatpush.msra.mxu1 %v2406_v13  ;;  %v2439_v57 = vld [vmem:[#allocation5 + $0x1a8] sm:$0xff] }
 0x10a   :  { %973 = vmatpush.msra.mxu2 %v2408_v14  ;;  %993 = vmatpush.msra.mxu3 %v2412_v21 }
 0x10b   :  { %503 = vst [vmem:[%s2874_s4] sm:$0xff] %v502_v60  ;;  %954 = vmatpush.msra.mxu1 %v2427_v12  ;;  %v2441_v60 = vld [vmem:[#allocation5 + $0x1b0] sm:$0xff] }
 0x10c   :  { %974 = vmatpush.msra.mxu2 %v2429_v51  ;;  %994 = vmatpush.msra.mxu3 %v2433_v53 }
 0x10d   :  { %955 = vmatpush.msra.mxu1 %v2439_v57 }
 0x10e   :  { %975 = vmatpush.msra.mxu2 %v2441_v60 }
 0x184   :  { %v592_v61 = vpop.f32.mrf.mxu0  ;;  %v612_v52 = vpop.f32.mrf.mxu1 }
 0x185   :  { %v655_v39 = vadd.f32 %v592_v61, %v2320_v10  ;;  %v656_v26 = vadd.f32 %v612_v52, %v2322_v11  ;;  %v2445_v61 = vld [vmem:[#allocation5 + $0x1b8] sm:$0xff]  ;;  %v2449_v52 = vld [vmem:[#allocation5 + $0x180] sm:$0xff] }
 0x186   :  { %995 = vmatpush.msra.mxu3 %v2445_v61 }
 0x187   :  { %v659_v17 = vmul.f32 0.5, %v655_v39  ;;  %v663_v18 = vmul.f32 0.5, %v656_v26  ;;  %v2451_v39 = vld [vmem:[#allocation5 + $0x188] sm:$0xff]  ;;  %v2453_v26 = vld [vmem:[#allocation5 + $0x190] sm:$0xff] }
 0x188   :  { %956 = vmatpush.msra.mxu1 %v2451_v39  ;;  %976 = vmatpush.msra.mxu2 %v2453_v26 }
 0x189   :  { %1799 = vtanh.f32 %v659_v17  ;;  %v2457_v17 = vld [vmem:[#allocation5 + $0x198] sm:$0xff] }
 0x18a   :  { %1801 = vtanh.f32 %v663_v18  ;;  %996 = vmatpush.msra.mxu3 %v2457_v17  ;;  %v2461_v18 = vld [vmem:[#allocation5 + $0x160] sm:$0xff] }
 0x18b   :  { %v632_v10 = vpop.f32.mrf.mxu2  ;;  %v652_v11 = vpop.f32.mrf.mxu3 }
 0x18c   :  { %v657_v22 = vadd.f32 %v632_v10, %v2329_v15  ;;  %v658_v25 = vadd.f32 %v652_v11, %v2332_v16  ;;  %v2463_v10 = vld [vmem:[#allocation5 + $0x168] sm:$0xff]  ;;  %v2465_v11 = vld [vmem:[#allocation5 + $0x170] sm:$0xff] }
 0x18d   :  { %957 = vmatpush.msra.mxu1 %v2463_v10  ;;  %977 = vmatpush.msra.mxu2 %v2465_v11 }
 0x18e   :  { %1803 = vtanh.f32 %v657_v22  ;;  %v668_v1 = vmul.f32 0.5, %v658_v25  ;;  %v2469_v22 = vld [vmem:[#allocation5 + $0x178] sm:$0xff]  ;;  %v2473_v25 = vld [vmem:[#allocation5 + $0x140] sm:$0xff] }
 0x18f   :  { %v1800_v2 = vpop.eup %1799  ;;  %997 = vmatpush.msra.mxu3 %v2469_v22 }
 0x190   :  { %v1802_v4 = vpop.eup %1801  ;;  %v661_v5 = vmul.f32 0.5, %v1800_v2  ;;  %1805 = vtanh.f32 %v668_v1  ;;  %v2475_v1 = vld [vmem:[#allocation5 + $0x148] sm:$0xff]  ;;  %v2477_v2 = vld [vmem:[#allocation5 + $0x150] sm:$0xff] }
 0x191   :  { %v665_v27 = vmul.f32 0.5, %v1802_v4  ;;  %958 = vmatpush.msra.mxu1 %v2475_v1  ;;  %v2481_v4 = vld [vmem:[#allocation5 + $0x158] sm:$0xff]  ;;  %978 = vmatpush.msra.mxu2 %v2477_v2 }
 0x192   :  { %v662_v30 = vadd.f32 0.5, %v661_v5  ;;  %998 = vmatpush.msra.mxu3 %v2481_v4  ;;  %v2485_v5 = vld [vmem:[#allocation5 + $0x120] sm:$0xff] }
 0x193   :  { %v666_v31 = vadd.f32 0.5, %v665_v27  ;;  %v2487_v27 = vld [vmem:[#allocation5 + $0x128] sm:$0xff] }
 0x194   :  { %v1804_v34 = vpop.eup %1803  ;;  %959 = vmatpush.msra.mxu1 %v2487_v27 }
 0x195   :  { %v672_v35 = vmul.f32 %v666_v31, %v497_v48  ;;  %v673_v38 = vmul.f32 %v1804_v34, %v662_v30  ;;  %v2425_v48 = vld [vmem:[#allocation5 + $0x1c0] sm:$0xff]  ;;  %v2489_v30 = vld [vmem:[#allocation5 + $0x130] sm:$0xff]  ;;  %v2493_v31 = vld [vmem:[#allocation5 + $0x138] sm:$0xff] }
 0x196   :  { %v1806_v40 = vpop.eup %1805  ;;  %934 = vmatpush.msra.mxu0 %v2425_v48  ;;  %979 = vmatpush.msra.mxu2 %v2489_v30  ;;  %v2497_v34 = vld [vmem:[#allocation5 + $0x100] sm:$0xff] }
 0x197   :  { %v2418_v43 = vadd.f32 %v673_v38, %v672_v35  ;;  %v670_v15 = vmul.f32 0.5, %v1806_v40  ;;  %999 = vmatpush.msra.mxu3 %v2493_v31  ;;  %v2499_v35 = vld [vmem:[#allocation5 + $0x108] sm:$0xff]  ;;  %v2501_v38 = vld [vmem:[#allocation5 + $0x110] sm:$0xff]  ;;  %v2505_v40 = vld [vmem:[#allocation5 + $0x118] sm:$0xff] }
 0x198   :  { %935 = vmatpush.msra.mxu0 %v2437_v56  ;;  %960 = vmatpush.msra.mxu1 %v2499_v35 }
 0x199   :  { %1807 = vtanh.f32 %v2418_v43  ;;  %v671_v44 = vadd.f32 0.5, %v670_v15  ;;  %980 = vmatpush.msra.mxu2 %v2501_v38  ;;  %1000 = vmatpush.msra.mxu3 %v2505_v40  ;;  %v2509_v15 = vld [vmem:[#allocation5 + $0xe0] sm:$0xff] }
 0x19a   :  { %936 = vmatpush.msra.mxu0 %v2449_v52 }
 0x19c   :  { %937 = vmatpush.msra.mxu0 %v2461_v18 }
 0x19e   :  { %938 = vmatpush.msra.mxu0 %v2473_v25 }
 0x19f   :  { %v1808_v16 = vpop.eup %1807 }
 0x1a0   :  { %v676_v47 = vmul.f32 %v1808_v16, %v671_v44  ;;  %939 = vmatpush.msra.mxu0 %v2485_v5  ;;  %v2511_v44 = vld [vmem:[#allocation5 + $0xe8] sm:$0xff]  ;;  %v2513_v16 = vld [vmem:[#allocation5 + $0xf0] sm:$0xff] }
 0x1a1   :  { %961 = vmatpush.msra.mxu1 %v2511_v44  ;;  %981 = vmatpush.msra.mxu2 %v2513_v16 }
 0x1a2   :  { %v679_v0 = vadd.f32 %v676_v47, %v2949_v6  ;;  %770 = vmatmul.f32.vlgmr.msrb.gmra.mxu0 %v676_v47  ;;  %790 = vmatmul.f32.vlgmr.msrb.gmra.mxu1 %v676_v47  ;;  %v2521_v6 = vld [vmem:[#allocation5 + $0xc0] sm:$0xff] }
 0x1a3   :  { %810 = vmatmul.f32.vlgmr.msrb.gmra.mxu2 %v676_v47  ;;  %830 = vmatmul.f32.vlgmr.msrb.gmra.mxu3 %v676_v47  ;;  %v2517_v47 = vld [vmem:[#allocation5 + $0xf8] sm:$0xff] }
 0x1a4   :  { %v680_v7 = vmax.f32 %v679_v0, 0.0  ;;  %940 = vmatpush.msra.mxu0 %v2497_v34  ;;  %1001 = vmatpush.msra.mxu3 %v2517_v47  ;;  %v2523_v0 = vld [vmem:[#allocation5 + $0xc8] sm:$0xff] }
 0x1a5   :  { %962 = vmatpush.msra.mxu1 %v2523_v0 }
 0x1a6   :  { %1771 = vst [vmem:[%s2874_s4 + $0x8] sm:$0xff] %v680_v7  ;;  %941 = vmatpush.msra.mxu0 %v2509_v15  ;;  %v2525_v7 = vld [vmem:[#allocation5 + $0xd0] sm:$0xff]  ;;  %1002 = vmatpush.msra.mxu3 %v2529_v9 }
 0x1a7   :  { %982 = vmatpush.msra.mxu2 %v2525_v7  ;;  %963 = vmatpush.msra.mxu1 %v2535_v63 }
 0x1a8   :  { %942 = vmatpush.msra.mxu0 %v2521_v6  ;;  %1003 = vmatpush.msra.mxu3 %v2541_v59 }
 0x1a9   :  { %983 = vmatpush.msra.mxu2 %v2537_v62  ;;  %964 = vmatpush.msra.mxu1 %v2547_v55 }
 0x1aa   :  { %943 = vmatpush.msra.mxu0 %v2533_v8  ;;  %1004 = vmatpush.msra.mxu3 %v2553_v50 }
 0x1ab   :  { %984 = vmatpush.msra.mxu2 %v2549_v54  ;;  %965 = vmatpush.msra.mxu1 %v2559_v46 }
 0x1ac   :  { %944 = vmatpush.msra.mxu0 %v2545_v58  ;;  %1005 = vmatpush.msra.mxu3 %v2565_v42  ;;  %v2589_v42 = vld [vmem:[#allocation5 + $0x38] sm:$0xff] }
 0x1ad   :  { %985 = vmatpush.msra.mxu2 %v2561_v45  ;;  %966 = vmatpush.msra.mxu1 %v2571_v37  ;;  %2964 = vst [vmem:[#allocation45_spill] sm:$0xff] %v2589_v42  ;;  %v2593_v37 = vld [vmem:[#allocation5] sm:$0xff] }
 0x1ae   :  { %945 = vmatpush.msra.mxu0 %v2557_v49  ;;  %1006 = vmatpush.msra.mxu3 %v2577_v33  ;;  %2965 = vst [vmem:[#allocation46_spill] sm:$0xff] %v2593_v37  ;;  %v2599_v33 = vld [vmem:[#allocation5 + $0x10] sm:$0xff] }
 0x1af   :  { %986 = vmatpush.msra.mxu2 %v2573_v36  ;;  %967 = vmatpush.msra.mxu1 %v2583_v29  ;;  %v2595_v36 = vld [vmem:[#allocation5 + $0x8] sm:$0xff]  ;;  %2967 = vst [vmem:[#allocation48_spill] sm:$0xff] %v2599_v33 }
 0x1b0   :  { %946 = vmatpush.msra.mxu0 %v2569_v41  ;;  %1007 = vmatpush.msra.mxu3 %v2589_v42  ;;  %2966 = vst [vmem:[#allocation47_spill] sm:$0xff] %v2595_v36  ;;  %v2601_v41 = vld [vmem:[#allocation5 + $0x18] sm:$0xff] }
 0x1b1   :  { %987 = vmatpush.msra.mxu2 %v2585_v28  ;;  %968 = vmatpush.msra.mxu1 %v2595_v36  ;;  %2968 = vst [vmem:[#allocation49_spill] sm:$0xff] %v2601_v41 }
 0x1b2   :  { %947 = vmatpush.msra.mxu0 %v2581_v32  ;;  %1008 = vmatpush.msra.mxu3 %v2601_v41 }
 0x1b3   :  { %988 = vmatpush.msra.mxu2 %v2599_v33  ;;  %1132 = vmatpush.msrb.mxu1 %v2406_v13 }
 0x1b4   :  { %948 = vmatpush.msra.mxu0 %v2593_v37  ;;  %1172 = vmatpush.msrb.mxu3 %v2412_v21 }
 0x1b5   :  { %1152 = vmatpush.msrb.mxu2 %v2408_v14  ;;  %1133 = vmatpush.msrb.mxu1 %v2427_v12 }
 0x1b6   :  { %1112 = vmatpush.msrb.mxu0 %v2404_v3  ;;  %1173 = vmatpush.msrb.mxu3 %v2433_v53 }
 0x1b7   :  { %1153 = vmatpush.msrb.mxu2 %v2429_v51  ;;  %1134 = vmatpush.msrb.mxu1 %v2439_v57 }
 0x1b8   :  { %1113 = vmatpush.msrb.mxu0 %v2425_v48  ;;  %1174 = vmatpush.msrb.mxu3 %v2445_v61 }
 0x1b9   :  { %1154 = vmatpush.msrb.mxu2 %v2441_v60  ;;  %1135 = vmatpush.msrb.mxu1 %v2451_v39 }
 0x1ba   :  { %1114 = vmatpush.msrb.mxu0 %v2437_v56  ;;  %1175 = vmatpush.msrb.mxu3 %v2457_v17 }
 0x1bb   :  { %1155 = vmatpush.msrb.mxu2 %v2453_v26  ;;  %1136 = vmatpush.msrb.mxu1 %v2463_v10 }
 0x1bc   :  { %1115 = vmatpush.msrb.mxu0 %v2449_v52  ;;  %1176 = vmatpush.msrb.mxu3 %v2469_v22 }
 0x1bd   :  { %1156 = vmatpush.msrb.mxu2 %v2465_v11  ;;  %1137 = vmatpush.msrb.mxu1 %v2475_v1 }
 0x1be   :  { %1116 = vmatpush.msrb.mxu0 %v2461_v18  ;;  %1177 = vmatpush.msrb.mxu3 %v2481_v4 }
 0x1bf   :  { %1157 = vmatpush.msrb.mxu2 %v2477_v2  ;;  %1138 = vmatpush.msrb.mxu1 %v2487_v27 }
 0x1c0   :  { %1117 = vmatpush.msrb.mxu0 %v2473_v25  ;;  %1178 = vmatpush.msrb.mxu3 %v2493_v31 }
 0x1c1   :  { %1158 = vmatpush.msrb.mxu2 %v2489_v30  ;;  %1139 = vmatpush.msrb.mxu1 %v2499_v35 }
 0x1c2   :  { %1118 = vmatpush.msrb.mxu0 %v2485_v5  ;;  %1179 = vmatpush.msrb.mxu3 %v2505_v40 }
 0x1c3   :  { %1159 = vmatpush.msrb.mxu2 %v2501_v38  ;;  %1140 = vmatpush.msrb.mxu1 %v2511_v44 }
 0x1c4   :  { %1119 = vmatpush.msrb.mxu0 %v2497_v34  ;;  %1180 = vmatpush.msrb.mxu3 %v2517_v47 }
 0x1c5   :  { %1160 = vmatpush.msrb.mxu2 %v2513_v16  ;;  %1141 = vmatpush.msrb.mxu1 %v2523_v0 }
 0x1c6   :  { %1120 = vmatpush.msrb.mxu0 %v2509_v15  ;;  %1181 = vmatpush.msrb.mxu3 %v2529_v9 }
 0x1c7   :  { %1161 = vmatpush.msrb.mxu2 %v2525_v7  ;;  %1142 = vmatpush.msrb.mxu1 %v2535_v63 }
 0x1c8   :  { %1121 = vmatpush.msrb.mxu0 %v2521_v6  ;;  %1182 = vmatpush.msrb.mxu3 %v2541_v59 }
 0x1c9   :  { %1162 = vmatpush.msrb.mxu2 %v2537_v62  ;;  %1143 = vmatpush.msrb.mxu1 %v2547_v55 }
 0x1ca   :  { %1122 = vmatpush.msrb.mxu0 %v2533_v8  ;;  %1183 = vmatpush.msrb.mxu3 %v2553_v50 }
 0x1cb   :  { %1163 = vmatpush.msrb.mxu2 %v2549_v54  ;;  %1144 = vmatpush.msrb.mxu1 %v2559_v46 }
 0x1cc   :  { %1123 = vmatpush.msrb.mxu0 %v2545_v58 }
 0x1cd   :  { %1164 = vmatpush.msrb.mxu2 %v2561_v45 }
 0x1ce   :  { %1124 = vmatpush.msrb.mxu0 %v2557_v49 }
 0x21f   :  { %v771_v42 = vpop.f32.mrf.mxu0  ;;  %v791_v28 = vpop.f32.mrf.mxu1 }
 0x220   :  { %v834_v36 = vadd.f32 %v771_v42, %v2334_v19  ;;  %v835_v37 = vadd.f32 %v791_v28, %v2336_v20 }
 0x222   :  { %v838_v3 = vmul.f32 0.5, %v834_v36  ;;  %v842_v13 = vmul.f32 0.5, %v835_v37 }
 0x224   :  { %1809 = vtanh.f32 %v838_v3 }
 0x225   :  { %1811 = vtanh.f32 %v842_v13 }
 0x226   :  { %v811_v19 = vpop.f32.mrf.mxu2  ;;  %v831_v20 = vpop.f32.mrf.mxu3 }
 0x227   :  { %v836_v28 = vadd.f32 %v811_v19, %v2339_v23  ;;  %v837_v36 = vadd.f32 %v831_v20, %v2342_v24 }
 0x229   :  { %1813 = vtanh.f32 %v836_v28  ;;  %v847_v37 = vmul.f32 0.5, %v837_v36 }
 0x22a   :  { %v1810_v42 = vpop.eup %1809 }
 0x22b   :  { %v1812_v23 = vpop.eup %1811  ;;  %v840_v24 = vmul.f32 0.5, %v1810_v42  ;;  %1815 = vtanh.f32 %v847_v37 }
 0x22c   :  { %v844_v3 = vmul.f32 0.5, %v1812_v23  ;;  %v2970_v23 = vld [vmem:[#allocation37_spill] sm:$0xff] }
 0x22d   :  { %v841_v13 = vadd.f32 0.5, %v840_v24  ;;  %1184 = vmatpush.msrb.mxu3 %v2970_v23  ;;  %v2971_v24 = vld [vmem:[#allocation38_spill] sm:$0xff] }
 0x22e   :  { %v845_v19 = vadd.f32 0.5, %v844_v3  ;;  %1125 = vmatpush.msrb.mxu0 %v2971_v24  ;;  %v2972_v3 = vld [vmem:[#allocation39_spill] sm:$0xff]  ;;  %v2976_v24 = vld [vmem:[#allocation45_spill] sm:$0xff] }
 0x22f   :  { %v1814_v20 = vpop.eup %1813  ;;  %1145 = vmatpush.msrb.mxu1 %v2972_v3  ;;  %v2977_v3 = vld [vmem:[#allocation46_spill] sm:$0xff] }
 0x230   :  { %v851_v28 = vmul.f32 %v845_v19, %v2418_v43  ;;  %v852_v36 = vmul.f32 %v1814_v20, %v841_v13  ;;  %v2973_v19 = vld [vmem:[#allocation40_spill] sm:$0xff]  ;;  %v2974_v20 = vld [vmem:[#allocation41_spill] sm:$0xff]  ;;  %1126 = vmatpush.msrb.mxu0 %v2581_v32 }
 0x231   :  { %v1816_v37 = vpop.eup %1815  ;;  %1165 = vmatpush.msrb.mxu2 %v2973_v19  ;;  %1185 = vmatpush.msrb.mxu3 %v2974_v20 }
 0x232   :  { %v2650_v42 = vadd.f32 %v852_v36, %v851_v28  ;;  %v849_v43 = vmul.f32 0.5, %v1816_v37  ;;  %v1772_v36 = vld [vmem:[%s2870_s0 + $0x10] sm:$0xff]  ;;  %1146 = vmatpush.msrb.mxu1 %v2583_v29  ;;  %1127 = vmatpush.msrb.mxu0 %v2977_v3  ;;  %v2979_v29 = vld [vmem:[#allocation9_spill] sm:$0xff] }
 0x233   :  { %1186 = vmatpush.msrb.mxu3 %v2976_v24 }
 0x234   :  { %2969 = vst [vmem:[#allocation50_spill] sm:$0xff] %v2650_v42  ;;  %1817 = vtanh.f32 %v2650_v42  ;;  %v850_v13 = vadd.f32 0.5, %v849_v43  ;;  %v2975_v42 = vld [vmem:[#allocation44_spill] sm:$0xff]  ;;  %v2978_v43 = vld [vmem:[#allocation47_spill] sm:$0xff] }
 0x235   :  { %1166 = vmatpush.msrb.mxu2 %v2975_v42  ;;  %1147 = vmatpush.msrb.mxu1 %v2978_v43 }
 0x236   :  { %1187 = vmatpush.msrb.mxu3 %v2601_v41 }
 0x237   :  { %1167 = vmatpush.msrb.mxu2 %v2599_v33 }
 0x23a   :  { %v1818_v28 = vpop.eup %1817 }
 0x23b   :  { %v855_v37 = vmul.f32 %v1818_v28, %v850_v13  ;;  %v2980_v13 = vld [vmem:[#allocation31_spill] sm:$0xff]  ;;  %v2983_v28 = vld [vmem:[#allocation40_spill] sm:$0xff] }
 0x23d   :  { %v858_v19 = vadd.f32 %v1772_v36, %v855_v37  ;;  %949 = vmatmul.f32.vlgmr.msra.gmra.mxu0 %v855_v37  ;;  %969 = vmatmul.f32.vlgmr.msra.gmra.mxu1 %v855_v37  ;;  %v2984_v36 = vld [vmem:[#allocation41_spill] sm:$0xff] }
 0x23e   :  { %989 = vmatmul.f32.vlgmr.msra.gmra.mxu2 %v855_v37  ;;  %1009 = vmatmul.f32.vlgmr.msra.gmra.mxu3 %v855_v37  ;;  %v2985_v37 = vld [vmem:[#allocation43_spill] sm:$0xff] }
 0x23f   :  { %v859_v20 = vmax.f32 %v858_v19, 0.0  ;;  %1291 = vmatpush.msra.mxu0 %v2979_v29  ;;  %1311 = vmatpush.msra.mxu1 %v2980_v13  ;;  %v2981_v19 = vld [vmem:[#allocation38_spill] sm:$0xff] }
 0x240   :  { %1331 = vmatpush.msra.mxu2 %v2408_v14  ;;  %1351 = vmatpush.msra.mxu3 %v2412_v21 }
 0x241   :  { %1773 = vst [vmem:[%s2874_s4 + $0x10] sm:$0xff] %v859_v20  ;;  %1292 = vmatpush.msra.mxu0 %v2425_v48  ;;  %1312 = vmatpush.msra.mxu1 %v2427_v12  ;;  %v2982_v20 = vld [vmem:[#allocation39_spill] sm:$0xff] }
 0x242   :  { %1332 = vmatpush.msra.mxu2 %v2429_v51  ;;  %1352 = vmatpush.msra.mxu3 %v2433_v53 }
 0x243   :  { %1293 = vmatpush.msra.mxu0 %v2437_v56  ;;  %1313 = vmatpush.msra.mxu1 %v2439_v57 }
 0x244   :  { %1333 = vmatpush.msra.mxu2 %v2441_v60  ;;  %1353 = vmatpush.msra.mxu3 %v2445_v61 }
 0x245   :  { %1294 = vmatpush.msra.mxu0 %v2449_v52  ;;  %1314 = vmatpush.msra.mxu1 %v2451_v39 }
 0x246   :  { %1334 = vmatpush.msra.mxu2 %v2453_v26  ;;  %1354 = vmatpush.msra.mxu3 %v2457_v17 }
 0x247   :  { %1295 = vmatpush.msra.mxu0 %v2461_v18  ;;  %1315 = vmatpush.msra.mxu1 %v2463_v10 }
 0x248   :  { %1335 = vmatpush.msra.mxu2 %v2465_v11  ;;  %1355 = vmatpush.msra.mxu3 %v2469_v22 }
 0x249   :  { %1296 = vmatpush.msra.mxu0 %v2473_v25  ;;  %1316 = vmatpush.msra.mxu1 %v2475_v1 }
 0x24a   :  { %1336 = vmatpush.msra.mxu2 %v2477_v2  ;;  %1356 = vmatpush.msra.mxu3 %v2481_v4 }
 0x24b   :  { %1297 = vmatpush.msra.mxu0 %v2485_v5  ;;  %1317 = vmatpush.msra.mxu1 %v2487_v27 }
 0x24c   :  { %1337 = vmatpush.msra.mxu2 %v2489_v30  ;;  %1357 = vmatpush.msra.mxu3 %v2493_v31 }
 0x24d   :  { %1298 = vmatpush.msra.mxu0 %v2497_v34  ;;  %1318 = vmatpush.msra.mxu1 %v2499_v35 }
 0x24e   :  { %1338 = vmatpush.msra.mxu2 %v2501_v38  ;;  %1358 = vmatpush.msra.mxu3 %v2505_v40 }
 0x24f   :  { %1299 = vmatpush.msra.mxu0 %v2509_v15  ;;  %1319 = vmatpush.msra.mxu1 %v2511_v44 }
 0x250   :  { %1339 = vmatpush.msra.mxu2 %v2513_v16  ;;  %1359 = vmatpush.msra.mxu3 %v2517_v47 }
 0x251   :  { %1300 = vmatpush.msra.mxu0 %v2521_v6  ;;  %1320 = vmatpush.msra.mxu1 %v2523_v0 }
 0x252   :  { %1340 = vmatpush.msra.mxu2 %v2525_v7  ;;  %1360 = vmatpush.msra.mxu3 %v2529_v9 }
 0x253   :  { %1301 = vmatpush.msra.mxu0 %v2533_v8  ;;  %1321 = vmatpush.msra.mxu1 %v2535_v63 }
 0x254   :  { %1341 = vmatpush.msra.mxu2 %v2537_v62  ;;  %1361 = vmatpush.msra.mxu3 %v2541_v59 }
 0x255   :  { %1302 = vmatpush.msra.mxu0 %v2545_v58  ;;  %1322 = vmatpush.msra.mxu1 %v2547_v55 }
 0x256   :  { %1342 = vmatpush.msra.mxu2 %v2549_v54  ;;  %1362 = vmatpush.msra.mxu3 %v2553_v50 }
 0x257   :  { %1303 = vmatpush.msra.mxu0 %v2557_v49  ;;  %1323 = vmatpush.msra.mxu1 %v2559_v46  ;;  %v2988_v46 = vld [vmem:[#allocation13_spill] sm:$0xff]  ;;  %v2989_v49 = vld [vmem:[#allocation14_spill] sm:$0xff] }
 0x258   :  { %1343 = vmatpush.msra.mxu2 %v2561_v45  ;;  %1363 = vmatpush.msra.mxu3 %v2970_v23  ;;  %v2987_v23 = vld [vmem:[#allocation12_spill] sm:$0xff] }
 0x259   :  { %1304 = vmatpush.msra.mxu0 %v2981_v19  ;;  %1324 = vmatpush.msra.mxu1 %v2982_v20  ;;  %v2986_v19 = vld [vmem:[#allocation11_spill] sm:$0xff] }
 0x25a   :  { %1344 = vmatpush.msra.mxu2 %v2983_v28  ;;  %1364 = vmatpush.msra.mxu3 %v2984_v36 }
 0x25b   :  { %1305 = vmatpush.msra.mxu0 %v2581_v32  ;;  %1325 = vmatpush.msra.mxu1 %v2985_v37 }
 0x25c   :  { %1345 = vmatpush.msra.mxu2 %v2975_v42  ;;  %1365 = vmatpush.msra.mxu3 %v2976_v24 }
 0x25d   :  { %1306 = vmatpush.msra.mxu0 %v2977_v3  ;;  %1326 = vmatpush.msra.mxu1 %v2978_v43 }
 0x25e   :  { %1346 = vmatpush.msra.mxu2 %v2599_v33  ;;  %1366 = vmatpush.msra.mxu3 %v2601_v41 }
 0x2ba   :  { %v950_v20 = vpop.f32.mrf.mxu0  ;;  %v970_v28 = vpop.f32.mrf.mxu1 }
 0x2bb   :  { %v1013_v36 = vadd.f32 %v950_v20, %v2986_v19  ;;  %v1014_v32 = vadd.f32 %v970_v28, %v2987_v23  ;;  %v2990_v28 = vld [vmem:[#allocation50_spill] sm:$0xff] }
 0x2bd   :  { %v1017_v45 = vmul.f32 0.5, %v1013_v36  ;;  %v1021_v37 = vmul.f32 0.5, %v1014_v32 }
 0x2bf   :  { %1819 = vtanh.f32 %v1017_v45 }
 0x2c0   :  { %1821 = vtanh.f32 %v1021_v37 }
 0x2c1   :  { %v990_v42 = vpop.f32.mrf.mxu2  ;;  %v1010_v24 = vpop.f32.mrf.mxu3 }
 0x2c2   :  { %v1015_v3 = vadd.f32 %v990_v42, %v2988_v46  ;;  %v1016_v43 = vadd.f32 %v1010_v24, %v2989_v49 }
 0x2c4   :  { %1823 = vtanh.f32 %v1015_v3  ;;  %v1026_v33 = vmul.f32 0.5, %v1016_v43 }
 0x2c5   :  { %v1820_v50 = vpop.eup %1819 }
 0x2c6   :  { %v1822_v41 = vpop.eup %1821  ;;  %v1019_v54 = vmul.f32 0.5, %v1820_v50  ;;  %1825 = vtanh.f32 %v1026_v33  ;;  %v1774_v50 = vld [vmem:[%s2870_s0 + $0x18] sm:$0xff] }
 0x2c7   :  { %v1023_v55 = vmul.f32 0.5, %v1822_v41 }
 0x2c8   :  { %v1020_v19 = vadd.f32 0.5, %v1019_v54 }
 0x2c9   :  { %v1024_v20 = vadd.f32 0.5, %v1023_v55  ;;  %v2992_v55 = vld [vmem:[#allocation32_spill] sm:$0xff] }
 0x2ca   :  { %v1824_v23 = vpop.eup %1823 }
 0x2cb   :  { %v1030_v32 = vmul.f32 %v1024_v20, %v2990_v28  ;;  %v1031_v45 = vmul.f32 %v1824_v23, %v1020_v19 }
 0x2cc   :  { %v1826_v36 = vpop.eup %1825 }
 0x2cd   :  { %v2752_v37 = vadd.f32 %v1031_v45, %v1030_v32  ;;  %v1028_v46 = vmul.f32 0.5, %v1826_v36  ;;  %v3014_v45 = vld [vmem:[#allocation19_spill] sm:$0xff] }
 0x2cf   :  { %1827 = vtanh.f32 %v2752_v37  ;;  %v1029_v49 = vadd.f32 0.5, %v1028_v46 }
 0x2d5   :  { %v1828_v42 = vpop.eup %1827 }
 0x2d6   :  { %v1034_v41 = vmul.f32 %v1828_v42, %v1029_v49  ;;  %v1645_v49 = vld [vmem:[#allocation5 + $0x1e0] sm:$0xff]  ;;  %v1646_v42 = vld [vmem:[#allocation5 + $0x1e8] sm:$0xff] }
 0x2d8   :  { %v1037_v33 = vadd.f32 %v1774_v50, %v1034_v41  ;;  %1128 = vmatmul.f32.vlgmr.msrb.gmra.mxu0 %v1034_v41  ;;  %1148 = vmatmul.f32.vlgmr.msrb.gmra.mxu1 %v1034_v41  ;;  %v1647_v50 = vld [vmem:[#allocation5 + $0x1f0] sm:$0xff] }
 0x2d9   :  { %1168 = vmatmul.f32.vlgmr.msrb.gmra.mxu2 %v1034_v41  ;;  %1188 = vmatmul.f32.vlgmr.msrb.gmra.mxu3 %v1034_v41 }
 0x2da   :  { %v1038_v54 = vmax.f32 %v1037_v33, 0.0  ;;  %1470 = vmatpush.msrb.mxu0 %v2979_v29  ;;  %1490 = vmatpush.msrb.mxu1 %v2980_v13  ;;  %v2991_v29 = vld [vmem:[#allocation10_spill] sm:$0xff]  ;;  %v1776_v13 = vld [vmem:[%s2870_s0 + $0x20] sm:$0xff] }
 0x2db   :  { %1510 = vmatpush.msrb.mxu2 %v2408_v14  ;;  %1530 = vmatpush.msrb.mxu3 %v2412_v21  ;;  %v2993_v14 = vld [vmem:[#allocation33_spill] sm:$0xff]  ;;  %v2994_v21 = vld [vmem:[#allocation34_spill] sm:$0xff] }
 0x2dc   :  { %1775 = vst [vmem:[%s2874_s4 + $0x18] sm:$0xff] %v1038_v54  ;;  %1471 = vmatpush.msrb.mxu0 %v2425_v48  ;;  %1491 = vmatpush.msrb.mxu1 %v2427_v12  ;;  %v2995_v48 = vld [vmem:[#allocation35_spill] sm:$0xff]  ;;  %v3002_v12 = vld [vmem:[#allocation42_spill] sm:$0xff]  ;;  %v1648_v54 = vld [vmem:[#allocation5 + $0x1f8] sm:$0xff] }
 0x2dd   :  { %1511 = vmatpush.msrb.mxu2 %v2429_v51  ;;  %1531 = vmatpush.msrb.mxu3 %v2433_v53  ;;  %v3003_v51 = vld [vmem:[#allocation43_spill] sm:$0xff]  ;;  %v3004_v53 = vld [vmem:[#allocation44_spill] sm:$0xff] }
 0x2de   :  { %1472 = vmatpush.msrb.mxu0 %v2437_v56  ;;  %1492 = vmatpush.msrb.mxu1 %v2439_v57  ;;  %v3005_v56 = vld [vmem:[#allocation45_spill] sm:$0xff]  ;;  %v3006_v57 = vld [vmem:[#allocation46_spill] sm:$0xff] }
 0x2df   :  { %1512 = vmatpush.msrb.mxu2 %v2441_v60  ;;  %1532 = vmatpush.msrb.mxu3 %v2445_v61  ;;  %v3007_v60 = vld [vmem:[#allocation47_spill] sm:$0xff]  ;;  %v3008_v61 = vld [vmem:[#allocation48_spill] sm:$0xff] }
 0x2e0   :  { %1473 = vmatpush.msrb.mxu0 %v2449_v52  ;;  %1493 = vmatpush.msrb.mxu1 %v2451_v39  ;;  %v3009_v52 = vld [vmem:[#allocation49_spill] sm:$0xff] }
 0x2e1   :  { %1513 = vmatpush.msrb.mxu2 %v2453_v26  ;;  %1533 = vmatpush.msrb.mxu3 %v2457_v17  ;;  %v3010_v17 = vld [vmem:[#allocation15_spill] sm:$0xff] }
 0x2e2   :  { %1474 = vmatpush.msrb.mxu0 %v2461_v18  ;;  %1494 = vmatpush.msrb.mxu1 %v2463_v10  ;;  %v3011_v10 = vld [vmem:[#allocation16_spill] sm:$0xff] }
 0x2e3   :  { %1514 = vmatpush.msrb.mxu2 %v2465_v11  ;;  %1534 = vmatpush.msrb.mxu3 %v2469_v22 }
 0x2e4   :  { %1475 = vmatpush.msrb.mxu0 %v2473_v25  ;;  %1495 = vmatpush.msrb.mxu1 %v2475_v1 }
 0x2e5   :  { %1515 = vmatpush.msrb.mxu2 %v2477_v2  ;;  %1535 = vmatpush.msrb.mxu3 %v2481_v4  ;;  %v3012_v4 = vld [vmem:[#allocation17_spill] sm:$0xff] }
 0x2e6   :  { %1476 = vmatpush.msrb.mxu0 %v2485_v5  ;;  %1496 = vmatpush.msrb.mxu1 %v2487_v27  ;;  %v3013_v27 = vld [vmem:[#allocation18_spill] sm:$0xff] }
 0x2e7   :  { %1516 = vmatpush.msrb.mxu2 %v2489_v30  ;;  %1536 = vmatpush.msrb.mxu3 %v2493_v31 }
 0x2e8   :  { %1477 = vmatpush.msrb.mxu0 %v2497_v34  ;;  %1497 = vmatpush.msrb.mxu1 %v2499_v35 }
 0x2e9   :  { %1517 = vmatpush.msrb.mxu2 %v2501_v38  ;;  %1537 = vmatpush.msrb.mxu3 %v2505_v40 }
 0x2ea   :  { %1478 = vmatpush.msrb.mxu0 %v2509_v15  ;;  %1498 = vmatpush.msrb.mxu1 %v2511_v44 }
 0x2eb   :  { %1518 = vmatpush.msrb.mxu2 %v2513_v16  ;;  %1538 = vmatpush.msrb.mxu3 %v2517_v47 }
 0x2ec   :  { %1479 = vmatpush.msrb.mxu0 %v2521_v6  ;;  %1499 = vmatpush.msrb.mxu1 %v2523_v0 }
 0x2ed   :  { %1519 = vmatpush.msrb.mxu2 %v2525_v7  ;;  %1539 = vmatpush.msrb.mxu3 %v2529_v9  ;;  %v2996_v9 = vld [vmem:[#allocation36_spill] sm:$0xff] }
 0x2ee   :  { %1480 = vmatpush.msrb.mxu0 %v2533_v8  ;;  %1500 = vmatpush.msrb.mxu1 %v2535_v63  ;;  %v2997_v8 = vld [vmem:[#allocation37_spill] sm:$0xff]  ;;  %v2998_v63 = vld [vmem:[#allocation38_spill] sm:$0xff] }
 0x2ef   :  { %1520 = vmatpush.msrb.mxu2 %v2537_v62  ;;  %1540 = vmatpush.msrb.mxu3 %v2541_v59  ;;  %v2999_v62 = vld [vmem:[#allocation39_spill] sm:$0xff]  ;;  %v3000_v59 = vld [vmem:[#allocation40_spill] sm:$0xff] }
 0x2f0   :  { %1481 = vmatpush.msrb.mxu0 %v2545_v58  ;;  %1501 = vmatpush.msrb.mxu1 %v2991_v29  ;;  %v3001_v58 = vld [vmem:[#allocation41_spill] sm:$0xff] }
 0x2f1   :  { %1521 = vmatpush.msrb.mxu2 %v2992_v55  ;;  %1541 = vmatpush.msrb.mxu3 %v2993_v14  ;;  %v3016_v14 = vld [vmem:[#allocation21_spill] sm:$0xff] }
 0x2f2   :  { %1482 = vmatpush.msrb.mxu0 %v2994_v21  ;;  %1502 = vmatpush.msrb.mxu1 %v2995_v48  ;;  %v3017_v48 = vld [vmem:[#allocation22_spill] sm:$0xff] }
 0x2f3   :  { %1522 = vmatpush.msrb.mxu2 %v2996_v9  ;;  %1542 = vmatpush.msrb.mxu3 %v2997_v8 }
 0x2f4   :  { %1483 = vmatpush.msrb.mxu0 %v2998_v63  ;;  %1503 = vmatpush.msrb.mxu1 %v2999_v62 }
 0x2f5   :  { %1523 = vmatpush.msrb.mxu2 %v3000_v59  ;;  %1543 = vmatpush.msrb.mxu3 %v3001_v58 }
 0x2f6   :  { %1484 = vmatpush.msrb.mxu0 %v3002_v12  ;;  %1504 = vmatpush.msrb.mxu1 %v3003_v51 }
 0x2f7   :  { %1524 = vmatpush.msrb.mxu2 %v3004_v53  ;;  %1544 = vmatpush.msrb.mxu3 %v3005_v56 }
 0x2f8   :  { %1485 = vmatpush.msrb.mxu0 %v3006_v57  ;;  %1505 = vmatpush.msrb.mxu1 %v3007_v60 }
 0x2f9   :  { %1525 = vmatpush.msrb.mxu2 %v3008_v61  ;;  %1545 = vmatpush.msrb.mxu3 %v3009_v52 }
 0x355   :  { %v1129_v39 = vpop.f32.mrf.mxu0  ;;  %v1149_v26 = vpop.f32.mrf.mxu1 }
 0x356   :  { %v1192_v18 = vadd.f32 %v1129_v39, %v3010_v17  ;;  %v1193_v11 = vadd.f32 %v1149_v26, %v3011_v10  ;;  %v1778_v17 = vld [vmem:[%s2870_s0 + $0x28] sm:$0xff] }
 0x358   :  { %v1196_v22 = vmul.f32 0.5, %v1192_v18  ;;  %v1200_v25 = vmul.f32 0.5, %v1193_v11 }
 0x35a   :  { %1829 = vtanh.f32 %v1196_v22  ;;  %v1641_v22 = vld [vmem:[#allocation5 + $0x1c0] sm:$0xff] }
 0x35b   :  { %1831 = vtanh.f32 %v1200_v25  ;;  %v1642_v25 = vld [vmem:[#allocation5 + $0x1c8] sm:$0xff] }
 0x35c   :  { %v1169_v1 = vpop.f32.mrf.mxu2  ;;  %v1189_v2 = vpop.f32.mrf.mxu3 }
 0x35d   :  { %v1194_v5 = vadd.f32 %v1169_v1, %v3012_v4  ;;  %v1195_v30 = vadd.f32 %v1189_v2, %v3013_v27  ;;  %v1643_v1 = vld [vmem:[#allocation5 + $0x1d0] sm:$0xff]  ;;  %v1644_v2 = vld [vmem:[#allocation5 + $0x1d8] sm:$0xff]  ;;  %v1637_v4 = vld [vmem:[#allocation5 + $0x1a0] sm:$0xff] }
 0x35e   :  { %v1639_v27 = vld [vmem:[#allocation5 + $0x1b0] sm:$0xff] }
 0x35f   :  { %1833 = vtanh.f32 %v1194_v5  ;;  %v1205_v31 = vmul.f32 0.5, %v1195_v30  ;;  %v1638_v5 = vld [vmem:[#allocation5 + $0x1a8] sm:$0xff]  ;;  %v1640_v30 = vld [vmem:[#allocation5 + $0x1b8] sm:$0xff] }
 0x360   :  { %v1830_v34 = vpop.eup %1829 }
 0x361   :  { %v1832_v35 = vpop.eup %1831  ;;  %v1198_v38 = vmul.f32 0.5, %v1830_v34  ;;  %1835 = vtanh.f32 %v1205_v31  ;;  %v1633_v31 = vld [vmem:[#allocation5 + $0x180] sm:$0xff]  ;;  %v1634_v34 = vld [vmem:[#allocation5 + $0x188] sm:$0xff] }
 0x362   :  { %v1202_v40 = vmul.f32 0.5, %v1832_v35  ;;  %v1635_v35 = vld [vmem:[#allocation5 + $0x190] sm:$0xff] }
 0x363   :  { %v1199_v15 = vadd.f32 0.5, %v1198_v38  ;;  %v1636_v38 = vld [vmem:[#allocation5 + $0x198] sm:$0xff] }
 0x364   :  { %v1203_v44 = vadd.f32 0.5, %v1202_v40  ;;  %v1629_v40 = vld [vmem:[#allocation5 + $0x160] sm:$0xff] }
 0x365   :  { %v1834_v16 = vpop.eup %1833 }
 0x366   :  { %v1209_v47 = vmul.f32 %v1203_v44, %v2752_v37  ;;  %v1210_v6 = vmul.f32 %v1834_v16, %v1199_v15  ;;  %v3015_v37 = vld [vmem:[#allocation20_spill] sm:$0xff]  ;;  %v1630_v15 = vld [vmem:[#allocation5 + $0x168] sm:$0xff]  ;;  %v1631_v44 = vld [vmem:[#allocation5 + $0x170] sm:$0xff] }
 0x367   :  { %v1836_v0 = vpop.eup %1835  ;;  %v1632_v16 = vld [vmem:[#allocation5 + $0x178] sm:$0xff] }
 0x368   :  { %v1211_v7 = vadd.f32 %v1210_v6, %v1209_v47  ;;  %v1207_v24 = vmul.f32 0.5, %v1836_v0  ;;  %v1625_v47 = vld [vmem:[#allocation5 + $0x140] sm:$0xff]  ;;  %v1626_v6 = vld [vmem:[#allocation5 + $0x148] sm:$0xff]  ;;  %v1627_v0 = vld [vmem:[#allocation5 + $0x150] sm:$0xff] }
 0x36a   :  { %1837 = vtanh.f32 %v1211_v7  ;;  %v1208_v3 = vadd.f32 0.5, %v1207_v24  ;;  %v1621_v24 = vld [vmem:[#allocation5 + $0x120] sm:$0xff] }
 0x370   :  { %v1838_v43 = vpop.eup %1837 }
 0x371   :  { %v1213_v19 = vmul.f32 %v1838_v43, %v1208_v3  ;;  %v1622_v3 = vld [vmem:[#allocation5 + $0x128] sm:$0xff]  ;;  %v1623_v43 = vld [vmem:[#allocation5 + $0x130] sm:$0xff] }
 0x373   :  { %v1216_v20 = vadd.f32 %v1776_v13, %v1213_v19  ;;  %1307 = vmatmul.f32.vlgmr.msra.gmra.mxu0 %v1213_v19  ;;  %1327 = vmatmul.f32.vlgmr.msra.gmra.mxu1 %v1213_v19  ;;  %v1624_v13 = vld [vmem:[#allocation5 + $0x138] sm:$0xff] }
 0x374   :  { %1347 = vmatmul.f32.vlgmr.msra.gmra.mxu2 %v1213_v19  ;;  %1367 = vmatmul.f32.vlgmr.msra.gmra.mxu3 %v1213_v19  ;;  %v1617_v19 = vld [vmem:[#allocation5 + $0x100] sm:$0xff] }
 0x375   :  { %v1217_v23 = vmax.f32 %v1216_v20, 0.0  ;;  %1649 = vmatpush.msra.mxu0 %v1645_v49  ;;  %1669 = vmatpush.msra.mxu1 %v1646_v42  ;;  %v1618_v20 = vld [vmem:[#allocation5 + $0x108] sm:$0xff]  ;;  %v1611_v42 = vld [vmem:[#allocation5 + $0xd0] sm:$0xff] }
 0x376   :  { %1689 = vmatpush.msra.mxu2 %v1647_v50  ;;  %1709 = vmatpush.msra.mxu3 %v1648_v54  ;;  %v1610_v49 = vld [vmem:[#allocation5 + $0xc8] sm:$0xff]  ;;  %v1612_v50 = vld [vmem:[#allocation5 + $0xd8] sm:$0xff]  ;;  %v1607_v54 = vld [vmem:[#allocation5 + $0xb0] sm:$0xff] }
 0x377   :  { %1777 = vst [vmem:[%s2874_s4 + $0x20] sm:$0xff] %v1217_v23  ;;  %1650 = vmatpush.msra.mxu0 %v1641_v22  ;;  %1670 = vmatpush.msra.mxu1 %v1642_v25  ;;  %v1619_v23 = vld [vmem:[#allocation5 + $0x110] sm:$0xff]  ;;  %v3019_v25 = vld [vmem:[#allocation24_spill] sm:$0xff] }
 0x378   :  { %1690 = vmatpush.msra.mxu2 %v1643_v1  ;;  %1710 = vmatpush.msra.mxu3 %v1644_v2 }
 0x379   :  { %1651 = vmatpush.msra.mxu0 %v1637_v4  ;;  %1671 = vmatpush.msra.mxu1 %v1638_v5 }
 0x37a   :  { %1691 = vmatpush.msra.mxu2 %v1639_v27  ;;  %1711 = vmatpush.msra.mxu3 %v1640_v30  ;;  %v3020_v30 = vld [vmem:[#allocation25_spill] sm:$0xff] }
 0x37b   :  { %1652 = vmatpush.msra.mxu0 %v1633_v31  ;;  %1672 = vmatpush.msra.mxu1 %v1634_v34  ;;  %v3021_v34 = vld [vmem:[#allocation26_spill] sm:$0xff] }
 0x37c   :  { %1692 = vmatpush.msra.mxu2 %v1635_v35  ;;  %1712 = vmatpush.msra.mxu3 %v1636_v38 }
 0x37d   :  { %1653 = vmatpush.msra.mxu0 %v1629_v40  ;;  %1673 = vmatpush.msra.mxu1 %v1630_v15 }
 0x37e   :  { %1693 = vmatpush.msra.mxu2 %v1631_v44  ;;  %1713 = vmatpush.msra.mxu3 %v1632_v16 }
 0x37f   :  { %1654 = vmatpush.msra.mxu0 %v1625_v47  ;;  %1674 = vmatpush.msra.mxu1 %v1626_v6 }
 0x380   :  { %1694 = vmatpush.msra.mxu2 %v1627_v0 }
 0x381   :  { %1655 = vmatpush.msra.mxu0 %v1621_v24  ;;  %1675 = vmatpush.msra.mxu1 %v1622_v3 }
 0x382   :  { %1695 = vmatpush.msra.mxu2 %v1623_v43 }
 0x383   :  { %1656 = vmatpush.msra.mxu0 %v1617_v19  ;;  %1676 = vmatpush.msra.mxu1 %v1618_v20 }
 0x384   :  { %1696 = vmatpush.msra.mxu2 %v1619_v23  ;;  %v1780_v23 = vld [vmem:[%s2870_s0 + $0x30] sm:$0xff] }
 0x3f0   :  { %v1308_v28 = vpop.f32.mrf.mxu0  ;;  %v1328_v32 = vpop.f32.mrf.mxu1 }
 0x3f1   :  { %v1371_v36 = vadd.f32 %v1308_v28, %v3014_v45  ;;  %v1372_v46 = vadd.f32 %v1328_v32, %v3015_v37  ;;  %v1620_v28 = vld [vmem:[#allocation5 + $0x118] sm:$0xff]  ;;  %v1613_v32 = vld [vmem:[#allocation5 + $0xe0] sm:$0xff]  ;;  %v1614_v45 = vld [vmem:[#allocation5 + $0xe8] sm:$0xff] }
 0x3f2   :  { %1657 = vmatpush.msra.mxu0 %v1613_v32  ;;  %1677 = vmatpush.msra.mxu1 %v1614_v45  ;;  %v1616_v37 = vld [vmem:[#allocation5 + $0xf8] sm:$0xff] }
 0x3f3   :  { %v1375_v41 = vmul.f32 0.5, %v1371_v36  ;;  %v1379_v33 = vmul.f32 0.5, %v1372_v46  ;;  %v1615_v36 = vld [vmem:[#allocation5 + $0xf0] sm:$0xff]  ;;  %v1609_v46 = vld [vmem:[#allocation5 + $0xc0] sm:$0xff] }
 0x3f4   :  { %1697 = vmatpush.msra.mxu2 %v1615_v36  ;;  %1658 = vmatpush.msra.mxu0 %v1609_v46 }
 0x3f5   :  { %1839 = vtanh.f32 %v1375_v41  ;;  %1678 = vmatpush.msra.mxu1 %v1610_v49  ;;  %v1605_v41 = vld [vmem:[#allocation5 + $0xa0] sm:$0xff]  ;;  %v3023_v49 = vld [vmem:[#allocation28_spill] sm:$0xff] }
 0x3f6   :  { %1841 = vtanh.f32 %v1379_v33  ;;  %1698 = vmatpush.msra.mxu2 %v1611_v42  ;;  %v1606_v33 = vld [vmem:[#allocation5 + $0xa8] sm:$0xff]  ;;  %1659 = vmatpush.msra.mxu0 %v1605_v41 }
 0x3f7   :  { %v1348_v29 = vpop.f32.mrf.mxu2  ;;  %v1368_v55 = vpop.f32.mrf.mxu3  ;;  %1679 = vmatpush.msra.mxu1 %v1606_v33 }
 0x3f8   :  { %v1373_v21 = vadd.f32 %v1348_v29, %v3016_v14  ;;  %v1374_v9 = vadd.f32 %v1368_v55, %v3017_v48  ;;  %v1608_v29 = vld [vmem:[#allocation5 + $0xb8] sm:$0xff]  ;;  %1699 = vmatpush.msra.mxu2 %v1607_v54  ;;  %v1601_v55 = vld [vmem:[#allocation5 + $0x80] sm:$0xff]  ;;  %v1602_v14 = vld [vmem:[#allocation5 + $0x88] sm:$0xff] }
 0x3f9   :  { %1660 = vmatpush.msra.mxu0 %v1601_v55  ;;  %1680 = vmatpush.msra.mxu1 %v1602_v14  ;;  %v1604_v48 = vld [vmem:[#allocation5 + $0x98] sm:$0xff]  ;;  %v3025_v14 = vld [vmem:[#allocation30_spill] sm:$0xff] }
 0x3fa   :  { %1843 = vtanh.f32 %v1373_v21  ;;  %v1384_v8 = vmul.f32 0.5, %v1374_v9  ;;  %v1603_v21 = vld [vmem:[#allocation5 + $0x90] sm:$0xff]  ;;  %v1597_v9 = vld [vmem:[#allocation5 + $0x60] sm:$0xff] }
 0x3fb   :  { %v1840_v63 = vpop.eup %1839  ;;  %1700 = vmatpush.msra.mxu2 %v1603_v21  ;;  %1661 = vmatpush.msra.mxu0 %v1597_v9 }
 0x3fc   :  { %v1842_v62 = vpop.eup %1841  ;;  %v1377_v59 = vmul.f32 0.5, %v1840_v63  ;;  %1845 = vtanh.f32 %v1384_v8  ;;  %v1598_v8 = vld [vmem:[#allocation5 + $0x68] sm:$0xff]  ;;  %v1599_v63 = vld [vmem:[#allocation5 + $0x70] sm:$0xff] }
 0x3fd   :  { %v1381_v58 = vmul.f32 0.5, %v1842_v62  ;;  %1681 = vmatpush.msra.mxu1 %v1598_v8  ;;  %v1600_v62 = vld [vmem:[#allocation5 + $0x78] sm:$0xff]  ;;  %1701 = vmatpush.msra.mxu2 %v1599_v63 }
 0x3fe   :  { %v1378_v12 = vadd.f32 0.5, %v1377_v59  ;;  %v1593_v59 = vld [vmem:[#allocation5 + $0x40] sm:$0xff] }
 0x3ff   :  { %v1382_v51 = vadd.f32 0.5, %v1381_v58  ;;  %v1594_v58 = vld [vmem:[#allocation5 + $0x48] sm:$0xff]  ;;  %1662 = vmatpush.msra.mxu0 %v1593_v59 }
 0x400   :  { %v1844_v53 = vpop.eup %1843  ;;  %1682 = vmatpush.msra.mxu1 %v1594_v58 }
 0x401   :  { %v1388_v56 = vmul.f32 %v1382_v51, %v1211_v7  ;;  %v1389_v57 = vmul.f32 %v1844_v53, %v1378_v12  ;;  %v1628_v7 = vld [vmem:[#allocation5 + $0x158] sm:$0xff]  ;;  %v1595_v12 = vld [vmem:[#allocation5 + $0x50] sm:$0xff]  ;;  %v1589_v53 = vld [vmem:[#allocation5 + $0x20] sm:$0xff] }
 0x402   :  { %v1846_v60 = vpop.eup %1845  ;;  %1714 = vmatpush.msra.mxu3 %v1628_v7  ;;  %v1596_v51 = vld [vmem:[#allocation5 + $0x58] sm:$0xff]  ;;  %1702 = vmatpush.msra.mxu2 %v1595_v12 }
 0x403   :  { %v2840_v61 = vadd.f32 %v1389_v57, %v1388_v56  ;;  %v1386_v52 = vmul.f32 0.5, %v1846_v60  ;;  %v1590_v56 = vld [vmem:[#allocation5 + $0x28] sm:$0xff]  ;;  %v1591_v57 = vld [vmem:[#allocation5 + $0x30] sm:$0xff]  ;;  %1663 = vmatpush.msra.mxu0 %v1589_v53  ;;  %v1592_v60 = vld [vmem:[#allocation5 + $0x38] sm:$0xff] }
 0x404   :  { %1715 = vmatpush.msra.mxu3 %v1624_v13  ;;  %1683 = vmatpush.msra.mxu1 %v1590_v56 }
 0x405   :  { %1847 = vtanh.f32 %v2840_v61  ;;  %v1387_v39 = vadd.f32 0.5, %v1386_v52  ;;  %1703 = vmatpush.msra.mxu2 %v1591_v57  ;;  %v1585_v52 = vld [vmem:[#allocation5] sm:$0xff] }
 0x406   :  { %1716 = vmatpush.msra.mxu3 %v1620_v28  ;;  %1664 = vmatpush.msra.mxu0 %v1585_v52 }
 0x408   :  { %1717 = vmatpush.msra.mxu3 %v1616_v37  ;;  %v3022_v37 = vld [vmem:[#allocation27_spill] sm:$0xff] }
 0x40a   :  { %1718 = vmatpush.msra.mxu3 %v1612_v50 }
 0x40b   :  { %v1848_v26 = vpop.eup %1847 }
 0x40c   :  { %v1392_v18 = vmul.f32 %v1848_v26, %v1387_v39  ;;  %1719 = vmatpush.msra.mxu3 %v1608_v29  ;;  %v1586_v39 = vld [vmem:[#allocation5 + $0x8] sm:$0xff]  ;;  %v1587_v26 = vld [vmem:[#allocation5 + $0x10] sm:$0xff]  ;;  %v3024_v29 = vld [vmem:[#allocation29_spill] sm:$0xff] }
 0x40d   :  { %1684 = vmatpush.msra.mxu1 %v1586_v39  ;;  %1704 = vmatpush.msra.mxu2 %v1587_v26  ;;  %v1782_v26 = vld [vmem:[%s2870_s0 + $0x38] sm:$0xff] }
 0x40e   :  { %v1395_v10 = vadd.f32 %v1778_v17, %v1392_v18  ;;  %1486 = vmatmul.f32.vlgmr.msrb.gmra.mxu0 %v1392_v18  ;;  %1506 = vmatmul.f32.vlgmr.msrb.gmra.mxu1 %v1392_v18  ;;  %v1588_v17 = vld [vmem:[#allocation5 + $0x18] sm:$0xff] }
 0x40f   :  { %1526 = vmatmul.f32.vlgmr.msrb.gmra.mxu2 %v1392_v18  ;;  %1546 = vmatmul.f32.vlgmr.msrb.gmra.mxu3 %v1392_v18 }
 0x410   :  { %v1396_v11 = vmax.f32 %v1395_v10, 0.0  ;;  %1720 = vmatpush.msra.mxu3 %v1604_v48 }
 0x412   :  { %1779 = vst [vmem:[%s2874_s4 + $0x28] sm:$0xff] %v1396_v11  ;;  %1721 = vmatpush.msra.mxu3 %v1600_v62  ;;  %v3018_v11 = vld [vmem:[#allocation23_spill] sm:$0xff] }
 0x414   :  { %1722 = vmatpush.msra.mxu3 %v1596_v51 }
 0x416   :  { %1723 = vmatpush.msra.mxu3 %v1592_v60 }
 0x418   :  { %1724 = vmatpush.msra.mxu3 %v1588_v17 }
 0x48b   :  { %v1487_v18 = vpop.f32.mrf.mxu0  ;;  %v1507_v10 = vpop.f32.mrf.mxu1 }
 0x48c   :  { %v1550_v22 = vadd.f32 %v1487_v18, %v3018_v11  ;;  %v1551_v1 = vadd.f32 %v1507_v10, %v3019_v25 }
 0x48e   :  { %v1554_v2 = vmul.f32 0.5, %v1550_v22  ;;  %v1558_v4 = vmul.f32 0.5, %v1551_v1 }
 0x490   :  { %1849 = vtanh.f32 %v1554_v2 }
 0x491   :  { %1851 = vtanh.f32 %v1558_v4 }
 0x492   :  { %v1527_v5 = vpop.f32.mrf.mxu2  ;;  %v1547_v27 = vpop.f32.mrf.mxu3 }
 0x493   :  { %v1552_v31 = vadd.f32 %v1527_v5, %v3020_v30  ;;  %v1553_v35 = vadd.f32 %v1547_v27, %v3021_v34 }
 0x495   :  { %1853 = vtanh.f32 %v1552_v31  ;;  %v1563_v38 = vmul.f32 0.5, %v1553_v35 }
 0x496   :  { %v1850_v40 = vpop.eup %1849 }
 0x497   :  { %v1852_v15 = vpop.eup %1851  ;;  %v1556_v44 = vmul.f32 0.5, %v1850_v40  ;;  %1855 = vtanh.f32 %v1563_v38 }
 0x498   :  { %v1560_v16 = vmul.f32 0.5, %v1852_v15 }
 0x499   :  { %v1557_v47 = vadd.f32 0.5, %v1556_v44 }
 0x49a   :  { %v1561_v6 = vadd.f32 0.5, %v1560_v16 }
 0x49b   :  { %v1854_v0 = vpop.eup %1853 }
 0x49c   :  { %v1567_v7 = vmul.f32 %v1561_v6, %v2840_v61  ;;  %v1568_v24 = vmul.f32 %v1854_v0, %v1557_v47 }
 0x49d   :  { %v1856_v3 = vpop.eup %1855 }
 0x49e   :  { %v1569_v43 = vadd.f32 %v1568_v24, %v1567_v7  ;;  %v1565_v13 = vmul.f32 0.5, %v1856_v3 }
 0x4a0   :  { %1857 = vtanh.f32 %v1569_v43  ;;  %v1566_v19 = vadd.f32 0.5, %v1565_v13 }
 0x4a6   :  { %v1858_v20 = vpop.eup %1857 }
 0x4a7   :  { %v1571_v28 = vmul.f32 %v1858_v20, %v1566_v19 }
 0x4a9   :  { %v1574_v32 = vadd.f32 %v1780_v23, %v1571_v28  ;;  %1665 = vmatmul.f32.vlgmr.msra.gmra.mxu0 %v1571_v28  ;;  %1685 = vmatmul.f32.vlgmr.msra.gmra.mxu1 %v1571_v28 }
 0x4aa   :  { %1705 = vmatmul.f32.vlgmr.msra.gmra.mxu2 %v1571_v28  ;;  %1725 = vmatmul.f32.vlgmr.msra.gmra.mxu3 %v1571_v28 }
 0x4ab   :  { %v1575_v45 = vmax.f32 %v1574_v32, 0.0 }
 0x4ad   :  { %1781 = vst [vmem:[%s2874_s4 + $0x30] sm:$0xff] %v1575_v45 }
 0x526   :  { %v1666_v61 = vpop.f32.mrf.mxu0  ;;  %v1686_v36 = vpop.f32.mrf.mxu1 }
 0x527   :  { %v1729_v46 = vadd.f32 %v1666_v61, %v3022_v37  ;;  %v1730_v42 = vadd.f32 %v1686_v36, %v3023_v49 }
 0x529   :  { %v1733_v50 = vmul.f32 0.5, %v1729_v46  ;;  %v1737_v41 = vmul.f32 0.5, %v1730_v42 }
 0x52b   :  { %1859 = vtanh.f32 %v1733_v50 }
 0x52c   :  { %1861 = vtanh.f32 %v1737_v41 }
 0x52d   :  { %v1706_v33 = vpop.f32.mrf.mxu2  ;;  %v1726_v54 = vpop.f32.mrf.mxu3 }
 0x52e   :  { %v1731_v55 = vadd.f32 %v1706_v33, %v3024_v29  ;;  %v1732_v21 = vadd.f32 %v1726_v54, %v3025_v14 }
 0x530   :  { %1863 = vtanh.f32 %v1731_v55  ;;  %v1742_v48 = vmul.f32 0.5, %v1732_v21 }
 0x531   :  { %v1860_v9 = vpop.eup %1859 }
 0x532   :  { %v1862_v8 = vpop.eup %1861  ;;  %v1735_v63 = vmul.f32 0.5, %v1860_v9  ;;  %1865 = vtanh.f32 %v1742_v48 }
 0x533   :  { %v1739_v62 = vmul.f32 0.5, %v1862_v8 }
 0x534   :  { %v1736_v59 = vadd.f32 0.5, %v1735_v63 }
 0x535   :  { %v1740_v58 = vadd.f32 0.5, %v1739_v62 }
 0x536   :  { %v1864_v12 = vpop.eup %1863 }
 0x537   :  { %v1746_v51 = vmul.f32 %v1740_v58, %v1569_v43  ;;  %v1747_v53 = vmul.f32 %v1864_v12, %v1736_v59 }
 0x538   :  { %v1866_v56 = vpop.eup %1865 }
 0x539   :  { %v1748_v57 = vadd.f32 %v1747_v53, %v1746_v51  ;;  %v1744_v60 = vmul.f32 0.5, %v1866_v56 }
 0x53b   :  { %1867 = vtanh.f32 %v1748_v57  ;;  %v1745_v52 = vadd.f32 0.5, %v1744_v60 }
 0x541   :  { %v1868_v39 = vpop.eup %1867 }
 0x542   :  { %v1750_v17 = vmul.f32 %v1868_v39, %v1745_v52 }
 0x544   :  { %v1753_v18 = vadd.f32 %v1782_v26, %v1750_v17 }
 0x546   :  { %v1754_v10 = vmax.f32 %v1753_v18, 0.0 }
 0x548   :  { %1783 = vst [vmem:[%s2874_s4 + $0x38] sm:$0xff] %v1754_v10 }
 0x549   :  { %1761 = vsyncpa [#allocation4], 1 }
 0x54a   :  { %1762 = vsyncpa [#allocation6], 1 }

</bundles_post_ra>
